<compile_context>
chip_gen: v6e
topology: v6e:2x2x1
jax: 0.10.0
libtpu: 0.0.40
codegen_flags: <defaults>
</compile_context>

<pallas_src>
import functools

import jax
import jax.numpy as jnp
from jax.experimental import pallas as pl
from jax.experimental.pallas import tpu as pltpu

ANCHOR_SIZES = (4.0, 8.0, 16.0)
NUM_CLASSES = 4          # foreground classes; +1 for background
NUM_PROPOSALS = 8        # top-K proposals kept per image

LANE = 128
_TM_MAX = 256                          # per-tile M rows (also forces >=2 tiles on v7x)
_VMEM_LIMIT_BYTES = 32 * 1024 * 1024   # explicit; footprint per kernel is < 1 MiB anyway


def _round_up(x, m):
    return ((x + m - 1) // m) * m


def _cdiv(a, b):
    return (a + b - 1) // b


def _choose_m_tiling(m_full):
    """Balanced M tiles; >= 2 tiles whenever possible so both v7x TensorCores get work."""
    num_m = max(_cdiv(m_full, _TM_MAX), 2 if m_full > 8 else 1)
    tm = _round_up(_cdiv(m_full, num_m), 8)
    num_m = _cdiv(m_full, tm)
    return tm, num_m, tm * num_m


# --------------------------- fused matmul + bias + act ----------------------

def _matmul_bias_act_kernel(a_ref, w_ref, b_ref, o_ref, *, relu):
    acc = jnp.dot(a_ref[...], w_ref[...], preferred_element_type=jnp.float32)
    out = acc + b_ref[...]
    if relu:
        out = jnp.maximum(out, 0.0)
    o_ref[...] = out.astype(o_ref.dtype)


def pallas_matmul_bias_act(a, w, b, *, relu, out_dtype):
    """(relu)(a @ w + b).  a: [M, K], w: [K, N], b: [N].

    Returns [M, N_p] with N_p = round_up(N, 128); columns >= N are exact zeros
    (lane-dense output).  K is untiled: weights/bias live fully in VMEM with a
    constant index map, the M axis is the only (parallel, auto-pipelined) grid axis.
    """
    M, K = a.shape
    Kw, N = w.shape
    assert K == Kw
    K_p = _round_up(K, 8)
    N_p = _round_up(N, LANE)
    tm, num_m, m_pad = _choose_m_tiling(M)

    a_p = jnp.pad(a.astype(jnp.bfloat16), ((0, m_pad - M), (0, K_p - K)))
    w_p = jnp.pad(w.astype(jnp.float32), ((0, K_p - K), (0, N_p - N))).astype(jnp.bfloat16)
    b_p = jnp.pad(b.astype(jnp.float32), (0, N_p - N)).reshape(1, N_p)

    y = pl.pallas_call(
        functools.partial(_matmul_bias_act_kernel, relu=relu),
        out_shape=jax.ShapeDtypeStruct((m_pad, N_p), out_dtype),
        grid=(num_m,),
        in_specs=[
            pl.BlockSpec((tm, K_p), lambda m: (m, 0)),      # auto-pipelined A tiles
            pl.BlockSpec((K_p, N_p), lambda m: (0, 0)),     # weights resident in VMEM
            pl.BlockSpec((1, N_p), lambda m: (0, 0)),       # bias resident in VMEM
        ],
        out_specs=pl.BlockSpec((tm, N_p), lambda m: (m, 0)),
        compiler_params=pltpu.CompilerParams(
            dimension_semantics=("parallel",),
            vmem_limit_bytes=_VMEM_LIMIT_BYTES,
        ),
    )(a_p, w_p, b_p)
    return y[:M]


# ------------------------------ conv via folded taps ------------------------

def conv2d_pallas(x, w, b, *, stride=1, pad=0, relu=True, out_dtype=jnp.bfloat16):
    """NHWC conv as a single Pallas matmul: all kh*kw taps folded into K (im2col built
    from the true Cin, so no zero-channel K work).

    x: [N, H, W, Cin]; w: [O, Cin, kh, kw] (PyTorch layout); b: [O].
    Returns [N, out_h, out_w, Cout_p], Cout_p = round_up(O, 128); channels >= O are
    exact zeros (lane-dense layout carried between layers).
    """
    N, H, W, Cin = x.shape
    O, Cin_w, kh, kw = w.shape
    assert Cin == Cin_w
    s = stride
    out_h = (H + 2 * pad - kh) // s + 1
    out_w = (W + 2 * pad - kw) // s + 1

    xp = jnp.pad(x, ((0, 0), (pad, pad), (pad, pad), (0, 0)))
    cols = []
    for di in range(kh):
        for dj in range(kw):
            cols.append(xp[:, di:di + s * (out_h - 1) + 1:s,
                           dj:dj + s * (out_w - 1) + 1:s, :])
    patches = jnp.concatenate(cols, axis=-1)                       # [N, oh, ow, kh*kw*Cin]
    a = patches.reshape(N * out_h * out_w, kh * kw * Cin)

    w_mat = jnp.transpose(w.astype(jnp.float32), (2, 3, 1, 0)).reshape(kh * kw * Cin, O)
    y = pallas_matmul_bias_act(a, w_mat, b, relu=relu, out_dtype=out_dtype)
    return y.reshape(N, out_h, out_w, -1)


# ------------------------- fused ROI head (one kernel) ----------------------

def _roi_head_kernel(a_ref, w1_ref, b1_ref, w2_ref, b2_ref, o_ref, *, nc1):
    """fc1+ReLU -> fused cls&reg matmul -> masked softmax over the nc1 class lanes.

    Output layout (lane-dense, width padded to 128):
      cols [0, nc1)          : class probabilities (exact softmax over the real lanes)
      cols [nc1, nc1 + 4*nc1): box regression deltas
      remaining cols         : zeros
    """
    h = jnp.dot(a_ref[...], w1_ref[...], preferred_element_type=jnp.float32)
    h = jnp.maximum(h + b1_ref[...], 0.0)
    out = jnp.dot(h.astype(jnp.bfloat16), w2_ref[...],
                  preferred_element_type=jnp.float32) + b2_ref[...]
    col = jax.lax.broadcasted_iota(jnp.int32, out.shape, 1)
    masked = jnp.where(col < nc1, out, jnp.full_like(out, -1e30))  # mask padded lanes
    mx = jnp.max(masked, axis=-1, keepdims=True)
    e = jnp.exp(masked - mx)
    probs = e / jnp.sum(e, axis=-1, keepdims=True)                 # exact softmax
    o_ref[...] = jnp.where(col < nc1, probs, out)


def pallas_roi_head(roi_feat, fc1_w, fc1_b, head_w, head_b, *, nc1):
    M, C = roi_feat.shape
    K1, N1 = fc1_w.shape
    assert C == K1
    K2, N2 = head_w.shape
    C_p = _round_up(C, 8)
    N1_p = _round_up(N1, 8)
    N_p = _round_up(N2, LANE)
    tm, num_m, m_pad = _choose_m_tiling(M)

    a = jnp.pad(roi_feat.astype(jnp.bfloat16), ((0, m_pad - M), (0, C_p - C)))
    w1 = jnp.pad(fc1_w.astype(jnp.float32), ((0, C_p - K1), (0, N1_p - N1))).astype(jnp.bfloat16)
    b1 = jnp.pad(fc1_b.astype(jnp.float32), (0, N1_p - N1)).reshape(1, N1_p)
    w2 = jnp.pad(head_w.astype(jnp.float32), ((0, N1_p - K2), (0, N_p - N2))).astype(jnp.bfloat16)
    b2 = jnp.pad(head_b.astype(jnp.float32), (0, N_p - N2)).reshape(1, N_p)

    y = pl.pallas_call(
        functools.partial(_roi_head_kernel, nc1=nc1),
        out_shape=jax.ShapeDtypeStruct((m_pad, N_p), jnp.float32),
        grid=(num_m,),
        in_specs=[
            pl.BlockSpec((tm, C_p), lambda m: (m, 0)),
            pl.BlockSpec((C_p, N1_p), lambda m: (0, 0)),
            pl.BlockSpec((1, N1_p), lambda m: (0, 0)),
            pl.BlockSpec((N1_p, N_p), lambda m: (0, 0)),
            pl.BlockSpec((1, N_p), lambda m: (0, 0)),
        ],
        out_specs=pl.BlockSpec((tm, N_p), lambda m: (m, 0)),
        compiler_params=pltpu.CompilerParams(
            dimension_semantics=("parallel",),
            vmem_limit_bytes=_VMEM_LIMIT_BYTES,
        ),
    )(a, w1, b1, w2, b2)
    return y[:M]


# ------------------------------ parameter init -----------------------------

def _xavier_normal_conv(key, o, c, kh, kw):
    fan_in = c * kh * kw
    fan_out = o * kh * kw
    std = (2.0 / (fan_in + fan_out)) ** 0.5
    return jax.random.normal(key, (o, c, kh, kw), jnp.float32) * std


def init_params(key):
    ks = jax.random.split(key, 8)
    A = len(ANCHOR_SIZES)
    nc1 = NUM_CLASSES + 1
    p = {}
    # backbone: conv 3->16 (3x3, s1, p1) + conv 16->32 (3x3, s2, p1)
    p["bb1_w"] = _xavier_normal_conv(ks[0], 16, 3, 3, 3)
    p["bb1_b"] = jnp.zeros((16,), jnp.float32)
    p["bb2_w"] = _xavier_normal_conv(ks[1], 32, 16, 3, 3)
    p["bb2_b"] = jnp.zeros((32,), jnp.float32)
    # rpn: 3x3 conv 32->32, 1x1 cls 32->A, 1x1 reg 32->4A (xavier, zero bias)
    p["rpn_w"] = _xavier_normal_conv(ks[2], 32, 32, 3, 3)
    p["rpn_b"] = jnp.zeros((32,), jnp.float32)
    p["rpn_cls_w"] = (_xavier_normal_conv(ks[3], A, 32, 1, 1)
                      .reshape(A, 32).T)                       # [32, A]
    p["rpn_cls_b"] = jnp.zeros((A,), jnp.float32)
    p["rpn_reg_w"] = (_xavier_normal_conv(ks[4], 4 * A, 32, 1, 1)
                      .reshape(4 * A, 32).T)                   # [32, 4A]
    p["rpn_reg_b"] = jnp.zeros((4 * A,), jnp.float32)
    # roi head: fc 32->64, cls 64->(NC+1), reg 64->4*(NC+1)  (normal(0, 0.01), zero bias)
    p["fc1_w"] = jax.random.normal(ks[5], (32, 64), jnp.float32) * 0.01
    p["fc1_b"] = jnp.zeros((64,), jnp.float32)
    p["cls_w"] = jax.random.normal(ks[6], (64, nc1), jnp.float32) * 0.01
    p["cls_b"] = jnp.zeros((nc1,), jnp.float32)
    p["reg_w"] = jax.random.normal(ks[7], (64, 4 * nc1), jnp.float32) * 0.01
    p["reg_b"] = jnp.zeros((4 * nc1,), jnp.float32)
    return p


# ------------------------------ box utilities ------------------------------

def _decode(anchors_cxcywh, deltas, img_h, img_w):
    cx = anchors_cxcywh[..., 0] + deltas[..., 0] * anchors_cxcywh[..., 2]
    cy = anchors_cxcywh[..., 1] + deltas[..., 1] * anchors_cxcywh[..., 3]
    w = anchors_cxcywh[..., 2] * jnp.exp(jnp.clip(deltas[..., 2], -4.0, 4.0))
    h = anchors_cxcywh[..., 3] * jnp.exp(jnp.clip(deltas[..., 3], -4.0, 4.0))
    x1 = jnp.clip(cx - w / 2, 0.0, img_w)
    y1 = jnp.clip(cy - h / 2, 0.0, img_h)
    x2 = jnp.clip(cx + w / 2, 0.0, img_w)
    y2 = jnp.clip(cy + h / 2, 0.0, img_h)
    return jnp.stack([x1, y1, x2, y2], axis=-1)


def _make_anchors(hf, wf, stride):
    ys = (jnp.arange(hf, dtype=jnp.float32) + 0.5) * stride
    xs = (jnp.arange(wf, dtype=jnp.float32) + 0.5) * stride
    cy, cx = jnp.meshgrid(ys, xs, indexing="ij")                 # [Hf, Wf]
    sizes = jnp.asarray(ANCHOR_SIZES, jnp.float32)               # [A]
    cx = jnp.broadcast_to(cx[..., None], (hf, wf, sizes.shape[0]))
    cy = jnp.broadcast_to(cy[..., None], (hf, wf, sizes.shape[0]))
    ws = jnp.broadcast_to(sizes, (hf, wf, sizes.shape[0]))
    anchors = jnp.stack([cx, cy, ws, ws], axis=-1)               # [Hf, Wf, A, 4]
    return anchors.reshape(hf * wf * sizes.shape[0], 4)


# ------------------------------- forward pass -------------------------------

def faster_rcnn_forward(params, image_nchw):
    x = jnp.transpose(image_nchw.astype(jnp.float32), (0, 2, 3, 1))  # -> NHWC
    B, H, W, _ = x.shape
    A = len(ANCHOR_SIZES)
    nc1 = NUM_CLASSES + 1
    c_bb2 = params["bb2_w"].shape[1]      # true channels fed to conv2 (16)
    c_rpn = params["rpn_w"].shape[1]      # true channels fed to rpn conv (32)
    c_fc1 = params["fc1_w"].shape[0]      # true channels fed to roi head (32)

    # ---- backbone (outputs lane-dense 128-wide bf16; true channels cropped per use) ----
    f1 = conv2d_pallas(x, params["bb1_w"], params["bb1_b"], stride=1, pad=1, relu=True)
    feat = conv2d_pallas(f1[..., :c_bb2], params["bb2_w"], params["bb2_b"],
                         stride=2, pad=1, relu=True)
    _, Hf, Wf, _ = feat.shape
    stride = H // Hf

    # ---- RPN: 3x3 conv, then the cls+reg 1x1 heads fused into ONE matmul ----
    r = conv2d_pallas(feat[..., :c_rpn], params["rpn_w"], params["rpn_b"],
                      stride=1, pad=1, relu=True)
    r2d = r[..., :c_rpn].reshape(B * Hf * Wf, c_rpn)
    rpn_head_w = jnp.concatenate([params["rpn_cls_w"], params["rpn_reg_w"]], axis=1)  # [32, 5A]
    rpn_head_b = jnp.concatenate([params["rpn_cls_b"], params["rpn_reg_b"]], axis=0)  # [5A]
    rpn_out = pallas_matmul_bias_act(r2d, rpn_head_w, rpn_head_b,
                                     relu=False, out_dtype=jnp.float32)    # [B*Hf*Wf, 128]
    rpn_cls = rpn_out[:, :A].reshape(B, Hf * Wf * A)                       # objectness logits
    rpn_reg = rpn_out[:, A:5 * A].reshape(B, Hf * Wf * A, 4)

    anchors = _make_anchors(Hf, Wf, float(stride))                    # [N_anchors, 4] cxcywh
    all_boxes = _decode(anchors[None], rpn_reg, float(H), float(W))   # [B, N_anchors, 4] xyxy

    # proposal selection (glue)
    # TODO(synk): NMS / variable-length per-image filtering has no clean Pallas equivalent.
    prop_scores, prop_idx = jax.lax.top_k(rpn_cls, NUM_PROPOSALS)     # [B, K]
    proposals = jnp.take_along_axis(all_boxes, prop_idx[..., None], axis=1)  # [B, K, 4]

    # ---- ROI head ----
    # crude 1x1 RoI pooling: sample backbone feature at proposal center cell (JAX gather glue)
    pcx = (proposals[..., 0] + proposals[..., 2]) * 0.5
    pcy = (proposals[..., 1] + proposals[..., 3]) * 0.5
    fx = jnp.clip((pcx / stride).astype(jnp.int32), 0, Wf - 1)
    fy = jnp.clip((pcy / stride).astype(jnp.int32), 0, Hf - 1)
    flat_idx = fy * Wf + fx                                           # [B, K]
    feat_flat = feat[..., :c_fc1].reshape(B, Hf * Wf, c_fc1)
    roi_feat = jnp.take_along_axis(feat_flat, flat_idx[..., None], axis=1)  # [B, K, c_fc1]

    K = NUM_PROPOSALS
    # fused ROI head: fc1+ReLU -> cls & reg (concatenated weights) -> softmax, one kernel
    roi_head_w = jnp.concatenate([params["cls_w"], params["reg_w"]], axis=1)   # [64, 5*nc1]
    roi_head_b = jnp.concatenate([params["cls_b"], params["reg_b"]], axis=0)
    y = pallas_roi_head(roi_feat.reshape(B * K, c_fc1), params["fc1_w"], params["fc1_b"],
                        roi_head_w, roi_head_b, nc1=nc1)                       # [B*K, 128]
    probs = y[:, :nc1]                                                         # [B*K, nc1]
    box_deltas = y[:, nc1:nc1 + 4 * nc1].reshape(B * K, nc1, 4)

    fg_probs = probs[:, 1:]
    labels = jnp.argmax(fg_probs, axis=-1).astype(jnp.int32) + 1               # [B*K]
    scores = jnp.max(fg_probs, axis=-1)                                        # [B*K]

    sel_deltas = jnp.take_along_axis(box_deltas, labels[:, None, None], axis=1)[:, 0, :]

    prop_flat = proposals.reshape(B * K, 4)
    prop_cxcywh = jnp.stack(
        [(prop_flat[:, 0] + prop_flat[:, 2]) * 0.5,
         (prop_flat[:, 1] + prop_flat[:, 3]) * 0.5,
         jnp.maximum(prop_flat[:, 2] - prop_flat[:, 0], 1.0),
         jnp.maximum(prop_flat[:, 3] - prop_flat[:, 1], 1.0)], axis=-1)
    final_boxes = _decode(prop_cxcywh, sel_deltas, float(H), float(W))         # [B*K, 4]

    pred_boxes = final_boxes.reshape(B, K, 4)
    pred_labels = labels.reshape(B, K)
    pred_scores = scores.reshape(B, K)
    return pred_boxes, pred_labels, pred_scores


# ----------------------------------- main -----------------------------------

if __name__ == "__main__":
    key = jax.random.PRNGKey(0)
    pkey, xkey = jax.random.split(key)
    params = init_params(pkey)
    image = jax.random.normal(xkey, (2, 3, 16, 16), jnp.float32)   # NCHW like PyTorch

    fwd = jax.jit(faster_rcnn_forward)
    pred_boxes, pred_labels, pred_scores = fwd(params, image)
    jax.block_until_ready((pred_boxes, pred_labels, pred_scores))

    assert pred_boxes.shape == (2, NUM_PROPOSALS, 4)
    assert pred_labels.shape == (2, NUM_PROPOSALS)
    assert pred_scores.shape == (2, NUM_PROPOSALS)
    assert bool(jnp.all(jnp.isfinite(pred_boxes)))
    assert bool(jnp.all(jnp.isfinite(pred_scores)))
    print("KERNEL_OK")
</pallas_src>

<mosaic_0001>
module attributes {stable_mosaic.version = 11 : i64} {
  func.func @_matmul_bias_act_kernel(%arg0: i32, %arg1: memref<256x32xbf16, #tpu.memory_space<vmem>>, %arg2: memref<32x128xbf16, #tpu.memory_space<vmem>>, %arg3: memref<1x128xf32, #tpu.memory_space<vmem>>, %arg4: memref<256x128xbf16, #tpu.memory_space<vmem>>) attributes {dimension_semantics = [#tpu.dimension_semantics<parallel>], iteration_bounds = array<i64: 2>, scalar_prefetch = 0 : i64, scratch_operands = 0 : i64, tpu.core_type = #tpu.core_type<tc>, window_params = [{transform_indices = @transform_0, window_bounds = array<i64: 256, 32>}, {pipeline_mode = #tpu.pipeline_mode<synchronous>, transform_indices = @transform_1, window_bounds = array<i64: 32, 128>}, {pipeline_mode = #tpu.pipeline_mode<synchronous>, transform_indices = @transform_2, window_bounds = array<i64: 1, 128>}, {transform_indices = @transform_3, window_bounds = array<i64: 256, 128>}]} {
    %c0 = arith.constant 0 : index
    %c0_0 = arith.constant 0 : index
    %0 = vector.load %arg1[%c0, %c0_0] : memref<256x32xbf16, #tpu.memory_space<vmem>>, vector<256x32xbf16>
    %c0_1 = arith.constant 0 : index
    %c0_2 = arith.constant 0 : index
    %1 = vector.load %arg2[%c0_1, %c0_2] : memref<32x128xbf16, #tpu.memory_space<vmem>>, vector<32x128xbf16>
    %cst = arith.constant dense<0.000000e+00> : vector<256x128xf32>
    %2 = tpu.matmul %0, %1, %cst {dimension_numbers = #tpu.dot_dimension_numbers<[1], [0], [0], [1], [0, 0, 1, 1], [], []>} : vector<256x32xbf16>, vector<32x128xbf16>, vector<256x128xf32> -> vector<256x128xf32>
    %c0_3 = arith.constant 0 : index
    %c0_4 = arith.constant 0 : index
    %3 = vector.load %arg3[%c0_3, %c0_4] : memref<1x128xf32, #tpu.memory_space<vmem>>, vector<1x128xf32>
    %4 = vector.broadcast %3 : vector<1x128xf32> to vector<256x128xf32>
    %5 = arith.addf %2, %4 : vector<256x128xf32>
    %cst_5 = arith.constant 0.000000e+00 : f32
    %6 = vector.broadcast %cst_5 : f32 to vector<256x128xf32>
    %7 = arith.maximumf %5, %6 : vector<256x128xf32>
    %8 = arith.truncf %7 : vector<256x128xf32> to vector<256x128xbf16>
    %c0_6 = arith.constant 0 : index
    %c0_7 = arith.constant 0 : index
    %9 = vector.load %arg4[%c0_6, %c0_7] : memref<256x128xbf16, #tpu.memory_space<vmem>>, vector<256x128xbf16>
    tpu.vector_store %arg4[%c0_6, %c0_7], %8 {strides = array<i32>} : memref<256x128xbf16, #tpu.memory_space<vmem>>, vector<256x128xbf16>,
    return
  }
  func.func @transform_0(%arg0: i32) -> (i32, i32) {
    %c0_i32 = arith.constant 0 : i32
    %c0_i32_0 = arith.constant 0 : i32
    return %arg0, %c0_i32 : i32, i32
  }
  func.func @transform_1(%arg0: i32) -> (i32, i32) {
    %c0_i32 = arith.constant 0 : i32
    %c0_i32_0 = arith.constant 0 : i32
    %c0_i32_1 = arith.constant 0 : i32
    return %c0_i32, %c0_i32_0 : i32, i32
  }
  func.func @transform_2(%arg0: i32) -> (i32, i32) {
    %c0_i32 = arith.constant 0 : i32
    %c0_i32_0 = arith.constant 0 : i32
    %c0_i32_1 = arith.constant 0 : i32
    return %c0_i32, %c0_i32_0 : i32, i32
  }
  func.func @transform_3(%arg0: i32) -> (i32, i32) {
    %c0_i32 = arith.constant 0 : i32
    %c0_i32_0 = arith.constant 0 : i32
    return %arg0, %c0_i32 : i32, i32
  }
}

module attributes {stable_mosaic.version = 11 : i64} {
  func.func @_matmul_bias_act_kernel(%arg0: i32, %arg1: memref<64x144xbf16, #tpu.memory_space<vmem>>, %arg2: memref<144x128xbf16, #tpu.memory_space<vmem>>, %arg3: memref<1x128xf32, #tpu.memory_space<vmem>>, %arg4: memref<64x128xbf16, #tpu.memory_space<vmem>>) attributes {dimension_semantics = [#tpu.dimension_semantics<parallel>], iteration_bounds = array<i64: 2>, scalar_prefetch = 0 : i64, scratch_operands = 0 : i64, tpu.core_type = #tpu.core_type<tc>, window_params = [{transform_indices = @transform_0, window_bounds = array<i64: 64, 144>}, {pipeline_mode = #tpu.pipeline_mode<synchronous>, transform_indices = @transform_1, window_bounds = array<i64: 144, 128>}, {pipeline_mode = #tpu.pipeline_mode<synchronous>, transform_indices = @transform_2, window_bounds = array<i64: 1, 128>}, {transform_indices = @transform_3, window_bounds = array<i64: 64, 128>}]} {
    %c0 = arith.constant 0 : index
    %c0_0 = arith.constant 0 : index
    %0 = vector.load %arg1[%c0, %c0_0] : memref<64x144xbf16, #tpu.memory_space<vmem>>, vector<64x144xbf16>
    %c0_1 = arith.constant 0 : index
    %c0_2 = arith.constant 0 : index
    %1 = vector.load %arg2[%c0_1, %c0_2] : memref<144x128xbf16, #tpu.memory_space<vmem>>, vector<144x128xbf16>
    %cst = arith.constant dense<0.000000e+00> : vector<64x128xf32>
    %2 = tpu.matmul %0, %1, %cst {dimension_numbers = #tpu.dot_dimension_numbers<[1], [0], [0], [1], [0, 0, 1, 1], [], []>} : vector<64x144xbf16>, vector<144x128xbf16>, vector<64x128xf32> -> vector<64x128xf32>
    %c0_3 = arith.constant 0 : index
    %c0_4 = arith.constant 0 : index
    %3 = vector.load %arg3[%c0_3, %c0_4] : memref<1x128xf32, #tpu.memory_space<vmem>>, vector<1x128xf32>
    %4 = vector.broadcast %3 : vector<1x128xf32> to vector<64x128xf32>
    %5 = arith.addf %2, %4 : vector<64x128xf32>
    %cst_5 = arith.constant 0.000000e+00 : f32
    %6 = vector.broadcast %cst_5 : f32 to vector<64x128xf32>
    %7 = arith.maximumf %5, %6 : vector<64x128xf32>
    %8 = arith.truncf %7 : vector<64x128xf32> to vector<64x128xbf16>
    %c0_6 = arith.constant 0 : index
    %c0_7 = arith.constant 0 : index
    %9 = vector.load %arg4[%c0_6, %c0_7] : memref<64x128xbf16, #tpu.memory_space<vmem>>, vector<64x128xbf16>
    tpu.vector_store %arg4[%c0_6, %c0_7], %8 {strides = array<i32>} : memref<64x128xbf16, #tpu.memory_space<vmem>>, vector<64x128xbf16>,
    return
  }
  func.func @transform_0(%arg0: i32) -> (i32, i32) {
    %c0_i32 = arith.constant 0 : i32
    %c0_i32_0 = arith.constant 0 : i32
    return %arg0, %c0_i32 : i32, i32
  }
  func.func @transform_1(%arg0: i32) -> (i32, i32) {
    %c0_i32 = arith.constant 0 : i32
    %c0_i32_0 = arith.constant 0 : i32
    %c0_i32_1 = arith.constant 0 : i32
    return %c0_i32, %c0_i32_0 : i32, i32
  }
  func.func @transform_2(%arg0: i32) -> (i32, i32) {
    %c0_i32 = arith.constant 0 : i32
    %c0_i32_0 = arith.constant 0 : i32
    %c0_i32_1 = arith.constant 0 : i32
    return %c0_i32, %c0_i32_0 : i32, i32
  }
  func.func @transform_3(%arg0: i32) -> (i32, i32) {
    %c0_i32 = arith.constant 0 : i32
    %c0_i32_0 = arith.constant 0 : i32
    return %arg0, %c0_i32 : i32, i32
  }
}

module attributes {stable_mosaic.version = 11 : i64} {
  func.func @_matmul_bias_act_kernel(%arg0: i32, %arg1: memref<64x288xbf16, #tpu.memory_space<vmem>>, %arg2: memref<288x128xbf16, #tpu.memory_space<vmem>>, %arg3: memref<1x128xf32, #tpu.memory_space<vmem>>, %arg4: memref<64x128xbf16, #tpu.memory_space<vmem>>) attributes {dimension_semantics = [#tpu.dimension_semantics<parallel>], iteration_bounds = array<i64: 2>, scalar_prefetch = 0 : i64, scratch_operands = 0 : i64, tpu.core_type = #tpu.core_type<tc>, window_params = [{transform_indices = @transform_0, window_bounds = array<i64: 64, 288>}, {pipeline_mode = #tpu.pipeline_mode<synchronous>, transform_indices = @transform_1, window_bounds = array<i64: 288, 128>}, {pipeline_mode = #tpu.pipeline_mode<synchronous>, transform_indices = @transform_2, window_bounds = array<i64: 1, 128>}, {transform_indices = @transform_3, window_bounds = array<i64: 64, 128>}]} {
    %c0 = arith.constant 0 : index
    %c0_0 = arith.constant 0 : index
    %0 = vector.load %arg1[%c0, %c0_0] : memref<64x288xbf16, #tpu.memory_space<vmem>>, vector<64x288xbf16>
    %c0_1 = arith.constant 0 : index
    %c0_2 = arith.constant 0 : index
    %1 = vector.load %arg2[%c0_1, %c0_2] : memref<288x128xbf16, #tpu.memory_space<vmem>>, vector<288x128xbf16>
    %cst = arith.constant dense<0.000000e+00> : vector<64x128xf32>
    %2 = tpu.matmul %0, %1, %cst {dimension_numbers = #tpu.dot_dimension_numbers<[1], [0], [0], [1], [0, 0, 1, 1], [], []>} : vector<64x288xbf16>, vector<288x128xbf16>, vector<64x128xf32> -> vector<64x128xf32>
    %c0_3 = arith.constant 0 : index
    %c0_4 = arith.constant 0 : index
    %3 = vector.load %arg3[%c0_3, %c0_4] : memref<1x128xf32, #tpu.memory_space<vmem>>, vector<1x128xf32>
    %4 = vector.broadcast %3 : vector<1x128xf32> to vector<64x128xf32>
    %5 = arith.addf %2, %4 : vector<64x128xf32>
    %cst_5 = arith.constant 0.000000e+00 : f32
    %6 = vector.broadcast %cst_5 : f32 to vector<64x128xf32>
    %7 = arith.maximumf %5, %6 : vector<64x128xf32>
    %8 = arith.truncf %7 : vector<64x128xf32> to vector<64x128xbf16>
    %c0_6 = arith.constant 0 : index
    %c0_7 = arith.constant 0 : index
    %9 = vector.load %arg4[%c0_6, %c0_7] : memref<64x128xbf16, #tpu.memory_space<vmem>>, vector<64x128xbf16>
    tpu.vector_store %arg4[%c0_6, %c0_7], %8 {strides = array<i32>} : memref<64x128xbf16, #tpu.memory_space<vmem>>, vector<64x128xbf16>,
    return
  }
  func.func @transform_0(%arg0: i32) -> (i32, i32) {
    %c0_i32 = arith.constant 0 : i32
    %c0_i32_0 = arith.constant 0 : i32
    return %arg0, %c0_i32 : i32, i32
  }
  func.func @transform_1(%arg0: i32) -> (i32, i32) {
    %c0_i32 = arith.constant 0 : i32
    %c0_i32_0 = arith.constant 0 : i32
    %c0_i32_1 = arith.constant 0 : i32
    return %c0_i32, %c0_i32_0 : i32, i32
  }
  func.func @transform_2(%arg0: i32) -> (i32, i32) {
    %c0_i32 = arith.constant 0 : i32
    %c0_i32_0 = arith.constant 0 : i32
    %c0_i32_1 = arith.constant 0 : i32
    return %c0_i32, %c0_i32_0 : i32, i32
  }
  func.func @transform_3(%arg0: i32) -> (i32, i32) {
    %c0_i32 = arith.constant 0 : i32
    %c0_i32_0 = arith.constant 0 : i32
    return %arg0, %c0_i32 : i32, i32
  }
}

module attributes {stable_mosaic.version = 11 : i64} {
  func.func @_matmul_bias_act_kernel(%arg0: i32, %arg1: memref<64x32xbf16, #tpu.memory_space<vmem>>, %arg2: memref<32x128xbf16, #tpu.memory_space<vmem>>, %arg3: memref<1x128xf32, #tpu.memory_space<vmem>>, %arg4: memref<64x128xf32, #tpu.memory_space<vmem>>) attributes {dimension_semantics = [#tpu.dimension_semantics<parallel>], iteration_bounds = array<i64: 2>, scalar_prefetch = 0 : i64, scratch_operands = 0 : i64, tpu.core_type = #tpu.core_type<tc>, window_params = [{transform_indices = @transform_0, window_bounds = array<i64: 64, 32>}, {pipeline_mode = #tpu.pipeline_mode<synchronous>, transform_indices = @transform_1, window_bounds = array<i64: 32, 128>}, {pipeline_mode = #tpu.pipeline_mode<synchronous>, transform_indices = @transform_2, window_bounds = array<i64: 1, 128>}, {transform_indices = @transform_3, window_bounds = array<i64: 64, 128>}]} {
    %c0 = arith.constant 0 : index
    %c0_0 = arith.constant 0 : index
    %0 = vector.load %arg1[%c0, %c0_0] : memref<64x32xbf16, #tpu.memory_space<vmem>>, vector<64x32xbf16>
    %c0_1 = arith.constant 0 : index
    %c0_2 = arith.constant 0 : index
    %1 = vector.load %arg2[%c0_1, %c0_2] : memref<32x128xbf16, #tpu.memory_space<vmem>>, vector<32x128xbf16>
    %cst = arith.constant dense<0.000000e+00> : vector<64x128xf32>
    %2 = tpu.matmul %0, %1, %cst {dimension_numbers = #tpu.dot_dimension_numbers<[1], [0], [0], [1], [0, 0, 1, 1], [], []>} : vector<64x32xbf16>, vector<32x128xbf16>, vector<64x128xf32> -> vector<64x128xf32>
    %c0_3 = arith.constant 0 : index
    %c0_4 = arith.constant 0 : index
    %3 = vector.load %arg3[%c0_3, %c0_4] : memref<1x128xf32, #tpu.memory_space<vmem>>, vector<1x128xf32>
    %4 = vector.broadcast %3 : vector<1x128xf32> to vector<64x128xf32>
    %5 = arith.addf %2, %4 : vector<64x128xf32>
    %c0_5 = arith.constant 0 : index
    %c0_6 = arith.constant 0 : index
    %6 = vector.load %arg4[%c0_5, %c0_6] : memref<64x128xf32, #tpu.memory_space<vmem>>, vector<64x128xf32>
    tpu.vector_store %arg4[%c0_5, %c0_6], %5 {strides = array<i32>} : memref<64x128xf32, #tpu.memory_space<vmem>>, vector<64x128xf32>,
    return
  }
  func.func @transform_0(%arg0: i32) -> (i32, i32) {
    %c0_i32 = arith.constant 0 : i32
    %c0_i32_0 = arith.constant 0 : i32
    return %arg0, %c0_i32 : i32, i32
  }
  func.func @transform_1(%arg0: i32) -> (i32, i32) {
    %c0_i32 = arith.constant 0 : i32
    %c0_i32_0 = arith.constant 0 : i32
    %c0_i32_1 = arith.constant 0 : i32
    return %c0_i32, %c0_i32_0 : i32, i32
  }
  func.func @transform_2(%arg0: i32) -> (i32, i32) {
    %c0_i32 = arith.constant 0 : i32
    %c0_i32_0 = arith.constant 0 : i32
    %c0_i32_1 = arith.constant 0 : i32
    return %c0_i32, %c0_i32_0 : i32, i32
  }
  func.func @transform_3(%arg0: i32) -> (i32, i32) {
    %c0_i32 = arith.constant 0 : i32
    %c0_i32_0 = arith.constant 0 : i32
    return %arg0, %c0_i32 : i32, i32
  }
}

module attributes {stable_mosaic.version = 11 : i64} {
  func.func @_roi_head_kernel(%arg0: i32, %arg1: memref<8x32xbf16, #tpu.memory_space<vmem>>, %arg2: memref<32x64xbf16, #tpu.memory_space<vmem>>, %arg3: memref<1x64xf32, #tpu.memory_space<vmem>>, %arg4: memref<64x128xbf16, #tpu.memory_space<vmem>>, %arg5: memref<1x128xf32, #tpu.memory_space<vmem>>, %arg6: memref<8x128xf32, #tpu.memory_space<vmem>>) attributes {dimension_semantics = [#tpu.dimension_semantics<parallel>], iteration_bounds = array<i64: 2>, scalar_prefetch = 0 : i64, scratch_operands = 0 : i64, tpu.core_type = #tpu.core_type<tc>, window_params = [{transform_indices = @transform_0, window_bounds = array<i64: 8, 32>}, {pipeline_mode = #tpu.pipeline_mode<synchronous>, transform_indices = @transform_1, window_bounds = array<i64: 32, 64>}, {pipeline_mode = #tpu.pipeline_mode<synchronous>, transform_indices = @transform_2, window_bounds = array<i64: 1, 64>}, {pipeline_mode = #tpu.pipeline_mode<synchronous>, transform_indices = @transform_3, window_bounds = array<i64: 64, 128>}, {pipeline_mode = #tpu.pipeline_mode<synchronous>, transform_indices = @transform_4, window_bounds = array<i64: 1, 128>}, {transform_indices = @transform_5, window_bounds = array<i64: 8, 128>}]} {
    %c0 = arith.constant 0 : index
    %c0_0 = arith.constant 0 : index
    %0 = vector.load %arg1[%c0, %c0_0] : memref<8x32xbf16, #tpu.memory_space<vmem>>, vector<8x32xbf16>
    %c0_1 = arith.constant 0 : index
    %c0_2 = arith.constant 0 : index
    %1 = vector.load %arg2[%c0_1, %c0_2] : memref<32x64xbf16, #tpu.memory_space<vmem>>, vector<32x64xbf16>
    %cst = arith.constant dense<0.000000e+00> : vector<8x64xf32>
    %2 = tpu.matmul %0, %1, %cst {dimension_numbers = #tpu.dot_dimension_numbers<[1], [0], [0], [1], [0, 0, 1, 1], [], []>} : vector<8x32xbf16>, vector<32x64xbf16>, vector<8x64xf32> -> vector<8x64xf32>
    %c0_3 = arith.constant 0 : index
    %c0_4 = arith.constant 0 : index
    %3 = vector.load %arg3[%c0_3, %c0_4] : memref<1x64xf32, #tpu.memory_space<vmem>>, vector<1x64xf32>
    %4 = vector.broadcast %3 : vector<1x64xf32> to vector<8x64xf32>
    %5 = arith.addf %2, %4 : vector<8x64xf32>
    %cst_5 = arith.constant 0.000000e+00 : f32
    %6 = vector.broadcast %cst_5 : f32 to vector<8x64xf32>
    %7 = arith.maximumf %5, %6 : vector<8x64xf32>
    %8 = arith.truncf %7 : vector<8x64xf32> to vector<8x64xbf16>
    %c0_6 = arith.constant 0 : index
    %c0_7 = arith.constant 0 : index
    %9 = vector.load %arg4[%c0_6, %c0_7] : memref<64x128xbf16, #tpu.memory_space<vmem>>, vector<64x128xbf16>
    %cst_8 = arith.constant dense<0.000000e+00> : vector<8x128xf32>
    %10 = tpu.matmul %8, %9, %cst_8 {dimension_numbers = #tpu.dot_dimension_numbers<[1], [0], [0], [1], [0, 0, 1, 1], [], []>} : vector<8x64xbf16>, vector<64x128xbf16>, vector<8x128xf32> -> vector<8x128xf32>
    %c0_9 = arith.constant 0 : index
    %c0_10 = arith.constant 0 : index
    %11 = vector.load %arg5[%c0_9, %c0_10] : memref<1x128xf32, #tpu.memory_space<vmem>>, vector<1x128xf32>
    %12 = vector.broadcast %11 : vector<1x128xf32> to vector<8x128xf32>
    %13 = arith.addf %10, %12 : vector<8x128xf32>
    %14 = tpu.iota {dimensions = array<i32: 1>} : vector<8x128xi32>
    %c5_i32 = arith.constant 5 : i32
    %15 = vector.broadcast %c5_i32 : i32 to vector<8x128xi32>
    %16 = arith.cmpi slt, %14, %15 : vector<8x128xi32>
    %cst_11 = arith.constant -1.000000e+30 : f32
    %17 = vector.broadcast %cst_11 : f32 to vector<8x128xf32>
    %18 = arith.select %16, %13, %17 : vector<8x128xi1>, vector<8x128xf32>
    %cst_12 = arith.constant dense<0xFF800000> : vector<8xf32>
    %19 = vector.multi_reduction <maximumf>, %18, %cst_12 [1] : vector<8x128xf32> to vector<8xf32>
    %20 = vector.shape_cast %19 : vector<8xf32> to vector<8x1xf32>
    %21 = vector.broadcast %20 : vector<8x1xf32> to vector<8x128xf32>
    %22 = arith.subf %18, %21 : vector<8x128xf32>
    %23 = math.exp %22 : vector<8x128xf32>
    %cst_13 = arith.constant dense<0.000000e+00> : vector<8xf32>
    %24 = vector.multi_reduction <add>, %23, %cst_13 [1] : vector<8x128xf32> to vector<8xf32>
    %25 = vector.shape_cast %24 : vector<8xf32> to vector<8x1xf32>
    %26 = vector.broadcast %25 : vector<8x1xf32> to vector<8x128xf32>
    %27 = arith.divf %23, %26 : vector<8x128xf32>
    %c5_i32_14 = arith.constant 5 : i32
    %28 = vector.broadcast %c5_i32_14 : i32 to vector<8x128xi32>
    %29 = arith.cmpi slt, %14, %28 : vector<8x128xi32>
    %30 = arith.select %29, %27, %13 : vector<8x128xi1>, vector<8x128xf32>
    %c0_15 = arith.constant 0 : index
    %c0_16 = arith.constant 0 : index
    %31 = vector.load %arg6[%c0_15, %c0_16] : memref<8x128xf32, #tpu.memory_space<vmem>>, vector<8x128xf32>
    tpu.vector_store %arg6[%c0_15, %c0_16], %30 {strides = array<i32>} : memref<8x128xf32, #tpu.memory_space<vmem>>, vector<8x128xf32>,
    return
  }
  func.func @transform_0(%arg0: i32) -> (i32, i32) {
    %c0_i32 = arith.constant 0 : i32
    %c0_i32_0 = arith.constant 0 : i32
    return %arg0, %c0_i32 : i32, i32
  }
  func.func @transform_1(%arg0: i32) -> (i32, i32) {
    %c0_i32 = arith.constant 0 : i32
    %c0_i32_0 = arith.constant 0 : i32
    %c0_i32_1 = arith.constant 0 : i32
    return %c0_i32, %c0_i32_0 : i32, i32
  }
  func.func @transform_2(%arg0: i32) -> (i32, i32) {
    %c0_i32 = arith.constant 0 : i32
    %c0_i32_0 = arith.constant 0 : i32
    %c0_i32_1 = arith.constant 0 : i32
    return %c0_i32, %c0_i32_0 : i32, i32
  }
  func.func @transform_3(%arg0: i32) -> (i32, i32) {
    %c0_i32 = arith.constant 0 : i32
    %c0_i32_0 = arith.constant 0 : i32
    %c0_i32_1 = arith.constant 0 : i32
    return %c0_i32, %c0_i32_0 : i32, i32
  }
  func.func @transform_4(%arg0: i32) -> (i32, i32) {
    %c0_i32 = arith.constant 0 : i32
    %c0_i32_0 = arith.constant 0 : i32
    %c0_i32_1 = arith.constant 0 : i32
    return %c0_i32, %c0_i32_0 : i32, i32
  }
  func.func @transform_5(%arg0: i32) -> (i32, i32) {
    %c0_i32 = arith.constant 0 : i32
    %c0_i32_0 = arith.constant 0 : i32
    return %arg0, %c0_i32 : i32, i32
  }
}

</mosaic_0001>

<bundles_post_ra>
// kernel: faster_rcnn_forward.5
= control target key start
LH: loop header
LB: loop body
LE: loop exit
PB: predicated region body
PF: predicated region fallthrough
CT: control target
= control target key end

     0   :  { %s1085_s12 = smov 0   ;;  %s1204_s0 = inlined_call_operand.vmem [shape: bf16[512,32], index: 0, kind: input, shape index: {}]   ;;  %s1205_s1 = inlined_call_operand.vmem [shape: bf16[32,128], index: 1, kind: input, shape index: {}]   ;;  %s1206_s2 = inlined_call_operand.vmem [shape: f32[1,128], index: 2, kind: input, shape index: {}]   ;;  %s1207_s3 = inlined_call_operand.vmem [shape: bf16[512,128], index: 3, kind: output, shape index: {}]  }
   0x1 LB: > { %s768_s13 = sadd.s32 4294967295, %s1063_s12   ;;  %p772_p0 = scmp.ge.s32.totalorder %s1063_s12, 1  ;;  %s1063_s12 = sphi %s1085_s12, %s13_s12  }
   0x2   : > { %p138_p1 = scmp.lt.s32.totalorder %s1063_s12, 3 }
   0x4   : > { %p139_p2 = pnand %p772_p0, %p138_p1 }
   0x5   : > { %s773_s16 = sshll.u32 (!%p139_p2), %s768_s13, 5 }
   0x6   : > { %142 = sbr.rel (%p139_p2) target bundleno = 250 (0xfa), region = 32  ;;  %p163_p3 = scmp.lt.s32.totalorder (!%p139_p2), %s773_s16, 63 }
   0xb   : > { %v1039_v0 = vld [vmem:[%s1205_s1 + $0x8] sm:$0xff]   ;;  %v1040_v1 = vld [vmem:[%s1205_s1] sm:$0xff]   ;;  %s1209_s16 = smov (!%p163_p3, %s773_s16), 63  ;;  %vm310_vm0 = vcmask 261120  }
   0xc   : > { %991 = vmatprep.subr.bf16.mxu0 %v1039_v0  ;;  %1027 = vmatprep.subr.bf16.mxu1 %v1039_v0  ;;  %s774_s19 = sshll.u32 %s1209_s16, 2  ;;  %v1144_v19 = vld [vmem:[%s1206_s2] ss:$0 sm:$0xff] }
   0xd   : > { %992 = vmatpush3.bf16.msra.mxu0 %v1039_v0  ;;  %1029 = vmatpush3.bf16.msra.mxu1 %v1039_v0  ;;  %s1107_s22 = scalar_lea.vmem %s1204_s0, %s774_s19  ;;  %s1158_s27 = scalar_lea.vmem %s1207_s3, %s774_s19 }
   0xe   : > { %993 = vmatprep.subr.bf16.mxu0 %v1040_v1  ;;  %1028 = vmatprep.subr.bf16.mxu1 %v1040_v1  ;;  %v1041_v2 = vld [vmem:[%s1107_s22] sm:$0xff]   ;;  %v1043_v4 = vld [vmem:[%s1107_s22 + $0x8] sm:$0xff]   ;;  %v1045_v6 = vld [vmem:[%s1107_s22 + $0x10] sm:$0xff]  }
   0xf   : > { %v1042_v3 = vld [vmem:[%s1107_s22 + $0x40] sm:$0xff]   ;;  %995 = vmatprep.mubr.msk.bf16.mxu0 %vm310_vm0, %v1041_v2  ;;  %v1044_v5 = vld [vmem:[%s1107_s22 + $0x48] sm:$0xff]   ;;  %v1046_v7 = vld [vmem:[%s1107_s22 + $0x50] sm:$0xff]  }
  0x10   : > { %1011 = vmatprep.mubr.msk.bf16.mxu1 %vm310_vm0, %v1042_v3  ;;  %v1047_v8 = vld [vmem:[%s1107_s22 + $0x18] sm:$0xff]   ;;  %v1049_v10 = vld [vmem:[%s1107_s22 + $0x20] sm:$0xff]   ;;  %v1051_v12 = vld [vmem:[%s1107_s22 + $0x28] sm:$0xff]  }
  0x11   : > { %994 = vmatpush3.bf16.msra.mxu0 %v1040_v1  ;;  %1030 = vmatpush3.bf16.msra.mxu1 %v1040_v1  ;;  %v1048_v9 = vld [vmem:[%s1107_s22 + $0x58] sm:$0xff]   ;;  %v1050_v11 = vld [vmem:[%s1107_s22 + $0x60] sm:$0xff]   ;;  %v1052_v13 = vld [vmem:[%s1107_s22 + $0x68] sm:$0xff]  }
  0x12   : > { %v1053_v14 = vld [vmem:[%s1107_s22 + $0x30] sm:$0xff]   ;;  %v1055_v16 = vld [vmem:[%s1107_s22 + $0x38] sm:$0xff]  }
  0x13   : > { %v1054_v15 = vld [vmem:[%s1107_s22 + $0x70] sm:$0xff]   ;;  %v1056_v17 = vld [vmem:[%s1107_s22 + $0x78] sm:$0xff]  }
  0x14   : > { %996 = vmatmul.mubr.msk.bf16.vlgmr.msra.gmra.mxu0 %vm310_vm0, %v1043_v4  ;;  %1012 = vmatmul.mubr.msk.bf16.vlgmr.msra.gmra.mxu1 %vm310_vm0, %v1044_v5 }
  0x15   : > { %999 = vmatprep.mubr.msk.bf16.mxu0 %vm310_vm0, %v1045_v6  ;;  %1015 = vmatprep.mubr.msk.bf16.mxu1 %vm310_vm0, %v1046_v7 }
  0x1c   : > { %1000 = vmatmul.mubr.msk.bf16.gmra.mxu0 %vm310_vm0, %v1047_v8  ;;  %1016 = vmatmul.mubr.msk.bf16.gmra.mxu1 %vm310_vm0, %v1048_v9 }
  0x1d   : > { %1003 = vmatprep.mubr.msk.bf16.mxu0 %vm310_vm0, %v1049_v10  ;;  %1019 = vmatprep.mubr.msk.bf16.mxu1 %vm310_vm0, %v1050_v11 }
  0x24   : > { %1004 = vmatmul.mubr.msk.bf16.gmra.mxu0 %vm310_vm0, %v1051_v12  ;;  %1020 = vmatmul.mubr.msk.bf16.gmra.mxu1 %vm310_vm0, %v1052_v13 }
  0x25   : > { %1007 = vmatprep.mubr.msk.bf16.mxu0 %vm310_vm0, %v1053_v14  ;;  %1023 = vmatprep.mubr.msk.bf16.mxu1 %vm310_vm0, %v1054_v15 }
  0x2c   : > { %1008 = vmatmul.mubr.msk.bf16.gmra.mxu0 %vm310_vm0, %v1055_v16  ;;  %1024 = vmatmul.mubr.msk.bf16.gmra.mxu1 %vm310_vm0, %v1056_v17 }
  0xd4   : > { %v997_v18 = vpop.f32.mrf.mxu0  ;;  %v1013_v20 = vpop.f32.mrf.mxu1 }
  0xd5   : > { %v402_v22 = vadd.f32 %v997_v18, %v1144_v19  ;;  %v466_v24 = vadd.f32 %v1013_v20, %v1144_v19 }
  0xd6   : > { %v393_v21 = vpop.f32.mrf.mxu0  ;;  %v457_v23 = vpop.f32.mrf.mxu1 }
  0xd7   : > { %v394_v26 = vadd.f32 %v1144_v19, %v393_v21  ;;  %v458_v29 = vadd.f32 %v1144_v19, %v457_v23  ;;  %v522_v32 = vmax.f32 %v402_v22, 0.0  ;;  %v538_v36 = vmax.f32 %v466_v24, 0.0 }
  0xd8   : > { %v998_v25 = vpop.f32.mrf.mxu0  ;;  %v1014_v28 = vpop.f32.mrf.mxu1 }
  0xd9   : > { %v405_v27 = vadd.f32 %v998_v25, %v1144_v19  ;;  %v469_v30 = vadd.f32 %v1014_v28, %v1144_v19  ;;  %v520_v40 = vmax.f32 %v394_v26, 0.0  ;;  %v536_v44 = vmax.f32 %v458_v29, 0.0 }
  0xda   : > { %v396_v31 = vpop.f32.mrf.mxu0  ;;  %v460_v35 = vpop.f32.mrf.mxu1 }
  0xdb   : > { %v523_v33 = vmax.f32 %v405_v27, 0.0  ;;  %v397_v34 = vadd.f32 %v1144_v19, %v396_v31  ;;  %v539_v37 = vmax.f32 %v469_v30, 0.0  ;;  %v461_v38 = vadd.f32 %v1144_v19, %v460_v35 }
  0xdc   : > { %v1001_v39 = vpop.f32.mrf.mxu0  ;;  %v1017_v43 = vpop.f32.mrf.mxu1 }
  0xdd   : > { %v886_v41 = vpack.c.bf16 %v523_v33, %v522_v32  ;;  %v521_v42 = vmax.f32 %v397_v34, 0.0  ;;  %v926_v45 = vpack.c.bf16 %v539_v37, %v538_v36  ;;  %v537_v46 = vmax.f32 %v461_v38, 0.0 }
  0xde   : > { %v409_v47 = vpop.f32.mrf.mxu0  ;;  %v418_v49 = vadd.f32 %v1001_v39, %v1144_v19  ;;  %v473_v50 = vpop.f32.mrf.mxu1  ;;  %v482_v52 = vadd.f32 %v1017_v43, %v1144_v19 }
  0xdf   : > { %958 = vst [vmem:[%s1158_s27 + $0x8] sm:$0xff] %v886_v41   ;;  %v881_v48 = vpack.c.bf16 %v521_v42, %v520_v40  ;;  %966 = vst [vmem:[%s1158_s27 + $0x48] sm:$0xff] %v926_v45   ;;  %v921_v51 = vpack.c.bf16 %v537_v46, %v536_v44  ;;  %v410_v54 = vadd.f32 %v1144_v19, %v409_v47 }
  0xe0   : > { %v1002_v53 = vpop.f32.mrf.mxu0  ;;  %v1018_v56 = vpop.f32.mrf.mxu1  ;;  %v474_v57 = vadd.f32 %v1144_v19, %v473_v50  ;;  %v526_v60 = vmax.f32 %v418_v49, 0.0  ;;  %v542_v0 = vmax.f32 %v482_v52, 0.0 }
  0xe1   : > { %882 = vst [vmem:[%s1158_s27] sm:$0xff] %v881_v48   ;;  %v421_v55 = vadd.f32 %v1002_v53, %v1144_v19  ;;  %965 = vst [vmem:[%s1158_s27 + $0x40] sm:$0xff] %v921_v51   ;;  %v485_v58 = vadd.f32 %v1018_v56, %v1144_v19  ;;  %v524_v4 = vmax.f32 %v410_v54, 0.0 }
  0xe2   : > { %v412_v59 = vpop.f32.mrf.mxu0  ;;  %v476_v63 = vpop.f32.mrf.mxu1  ;;  %v540_v8 = vmax.f32 %v474_v57, 0.0 }
  0xe3   : > { %v527_v61 = vmax.f32 %v421_v55, 0.0  ;;  %v413_v62 = vadd.f32 %v1144_v19, %v412_v59  ;;  %v543_v1 = vmax.f32 %v485_v58, 0.0  ;;  %v477_v2 = vadd.f32 %v1144_v19, %v476_v63 }
  0xe4   : > { %v1005_v3 = vpop.f32.mrf.mxu0  ;;  %v1021_v7 = vpop.f32.mrf.mxu1 }
  0xe5   : > { %v896_v5 = vpack.c.bf16 %v527_v61, %v526_v60  ;;  %v525_v6 = vmax.f32 %v413_v62, 0.0  ;;  %v936_v9 = vpack.c.bf16 %v543_v1, %v542_v0  ;;  %v541_v10 = vmax.f32 %v477_v2, 0.0 }
  0xe6   : > { %v425_v11 = vpop.f32.mrf.mxu0  ;;  %v434_v13 = vadd.f32 %v1005_v3, %v1144_v19  ;;  %v489_v14 = vpop.f32.mrf.mxu1  ;;  %v498_v16 = vadd.f32 %v1021_v7, %v1144_v19 }
  0xe7   : > { %960 = vst [vmem:[%s1158_s27 + $0x18] sm:$0xff] %v896_v5   ;;  %v891_v12 = vpack.c.bf16 %v525_v6, %v524_v4  ;;  %968 = vst [vmem:[%s1158_s27 + $0x58] sm:$0xff] %v936_v9   ;;  %v931_v15 = vpack.c.bf16 %v541_v10, %v540_v8  ;;  %v426_v18 = vadd.f32 %v1144_v19, %v425_v11 }
  0xe8   : > { %v1006_v17 = vpop.f32.mrf.mxu0  ;;  %v1022_v21 = vpop.f32.mrf.mxu1  ;;  %v490_v22 = vadd.f32 %v1144_v19, %v489_v14  ;;  %v530_v25 = vmax.f32 %v434_v13, 0.0  ;;  %v546_v29 = vmax.f32 %v498_v16, 0.0 }
  0xe9   : > { %959 = vst [vmem:[%s1158_s27 + $0x10] sm:$0xff] %v891_v12   ;;  %v437_v20 = vadd.f32 %v1006_v17, %v1144_v19  ;;  %967 = vst [vmem:[%s1158_s27 + $0x50] sm:$0xff] %v931_v15   ;;  %v501_v23 = vadd.f32 %v1022_v21, %v1144_v19  ;;  %v528_v33 = vmax.f32 %v426_v18, 0.0 }
  0xea   : > { %v428_v24 = vpop.f32.mrf.mxu0  ;;  %v492_v28 = vpop.f32.mrf.mxu1  ;;  %v544_v37 = vmax.f32 %v490_v22, 0.0 }
  0xeb   : > { %v531_v26 = vmax.f32 %v437_v20, 0.0  ;;  %v429_v27 = vadd.f32 %v1144_v19, %v428_v24  ;;  %v547_v30 = vmax.f32 %v501_v23, 0.0  ;;  %v493_v31 = vadd.f32 %v1144_v19, %v492_v28 }
  0xec   : > { %v1009_v32 = vpop.f32.mrf.mxu0  ;;  %v1025_v36 = vpop.f32.mrf.mxu1 }
  0xed   : > { %v906_v34 = vpack.c.bf16 %v531_v26, %v530_v25  ;;  %v529_v35 = vmax.f32 %v429_v27, 0.0  ;;  %v946_v38 = vpack.c.bf16 %v547_v30, %v546_v29  ;;  %v545_v39 = vmax.f32 %v493_v31, 0.0 }
  0xee   : > { %v441_v40 = vpop.f32.mrf.mxu0  ;;  %v450_v42 = vadd.f32 %v1009_v32, %v1144_v19  ;;  %v505_v43 = vpop.f32.mrf.mxu1  ;;  %v514_v45 = vadd.f32 %v1025_v36, %v1144_v19 }
  0xef   : > { %962 = vst [vmem:[%s1158_s27 + $0x28] sm:$0xff] %v906_v34   ;;  %v901_v41 = vpack.c.bf16 %v529_v35, %v528_v33  ;;  %970 = vst [vmem:[%s1158_s27 + $0x68] sm:$0xff] %v946_v38   ;;  %v941_v44 = vpack.c.bf16 %v545_v39, %v544_v37  ;;  %v442_v47 = vadd.f32 %v1144_v19, %v441_v40 }
  0xf0   : > { %v1010_v46 = vpop.f32.mrf.mxu0  ;;  %v1026_v49 = vpop.f32.mrf.mxu1  ;;  %v506_v50 = vadd.f32 %v1144_v19, %v505_v43  ;;  %v534_v53 = vmax.f32 %v450_v42, 0.0  ;;  %v550_v57 = vmax.f32 %v514_v45, 0.0 }
  0xf1   : > { %961 = vst [vmem:[%s1158_s27 + $0x20] sm:$0xff] %v901_v41   ;;  %v453_v48 = vadd.f32 %v1010_v46, %v1144_v19  ;;  %969 = vst [vmem:[%s1158_s27 + $0x60] sm:$0xff] %v941_v44   ;;  %v517_v51 = vadd.f32 %v1026_v49, %v1144_v19  ;;  %v532_v60 = vmax.f32 %v442_v47, 0.0 }
  0xf2   : > { %v444_v52 = vpop.f32.mrf.mxu0  ;;  %v508_v56 = vpop.f32.mrf.mxu1  ;;  %v548_v63 = vmax.f32 %v506_v50, 0.0 }
  0xf3   : > { %v535_v54 = vmax.f32 %v453_v48, 0.0  ;;  %v445_v55 = vadd.f32 %v1144_v19, %v444_v52  ;;  %v551_v58 = vmax.f32 %v517_v51, 0.0  ;;  %v509_v59 = vadd.f32 %v1144_v19, %v508_v56 }
  0xf5   : > { %v916_v61 = vpack.c.bf16 %v535_v54, %v534_v53  ;;  %v533_v62 = vmax.f32 %v445_v55, 0.0  ;;  %v956_v0 = vpack.c.bf16 %v551_v58, %v550_v57  ;;  %v549_v1 = vmax.f32 %v509_v59, 0.0 }
  0xf7   : > { %964 = vst [vmem:[%s1158_s27 + $0x38] sm:$0xff] %v916_v61   ;;  %v911_v2 = vpack.c.bf16 %v533_v62, %v532_v60  ;;  %972 = vst [vmem:[%s1158_s27 + $0x78] sm:$0xff] %v956_v0   ;;  %v951_v3 = vpack.c.bf16 %v549_v1, %v548_v63 }
  0xf9   : > { %963 = vst [vmem:[%s1158_s27 + $0x30] sm:$0xff] %v911_v2   ;;  %971 = vst [vmem:[%s1158_s27 + $0x70] sm:$0xff] %v951_v3  }
  0xfa PF: > { %s13_s12 = sadd.s32 1, %s1063_s12  }
  0xfb   : > { %p10_p4 = scmp.ge.s32.totalorder %s13_s12, 4  }
  0xfd   :  { %12 = sbr.rel (!%p10_p4) target bundleno = 1 (0x1), region = 62 }

// kernel: faster_rcnn_forward.6
= control target key start
LH: loop header
LB: loop body
LE: loop exit
PB: predicated region body
PF: predicated region fallthrough
CT: control target
= control target key end

     0   :  { %s634_s12 = smov 0   ;;  %s699_s0 = inlined_call_operand.vmem [shape: bf16[128,144], index: 0, kind: input, shape index: {}]   ;;  %s700_s1 = inlined_call_operand.vmem [shape: bf16[144,128], index: 1, kind: input, shape index: {}]   ;;  %s701_s2 = inlined_call_operand.vmem [shape: f32[1,128], index: 2, kind: input, shape index: {}]   ;;  %s702_s3 = inlined_call_operand.vmem [shape: bf16[128,128], index: 3, kind: output, shape index: {}]  }
   0x1 LB: > { %s483_s13 = sadd.s32 4294967295, %s611_s12   ;;  %p487_p0 = scmp.ge.s32.totalorder %s611_s12, 1  ;;  %s611_s12 = sphi %s634_s12, %s13_s12  }
   0x2   : > { %p139_p1 = scmp.lt.s32.totalorder %s611_s12, 3 }
   0x4   : > { %p140_p2 = pnand %p487_p0, %p139_p1 }
   0x5   : > { %s488_s16 = sshll.u32 (!%p140_p2), %s483_s13, 3 }
   0x6   : > { %143 = sbr.rel (%p140_p2) target bundleno = 260 (0x104), region = 32  ;;  %p165_p3 = scmp.lt.s32.totalorder (!%p140_p2), %s488_s16, 15 }
   0xb   : > { %v584_v0 = vld [vmem:[%s700_s1 + $0x38] sm:$0xff]   ;;  %v613_v1 = vmov 0   ;;  %v585_v2 = vld [vmem:[%s700_s1 + $0x30] sm:$0xff]   ;;  %s704_s16 = smov (!%p165_p3, %s488_s16), 15  ;;  %v586_v3 = vld [vmem:[%s700_s1 + $0x28] sm:$0xff]   ;;  %vm301_vm0 = vcmask 130048  }
   0xc   : > { %314 = vmatprep.subr.bf16.mxu0 %v613_v1  ;;  %557 = vmatprep.subr.bf16.mxu1 %v613_v1  ;;  %s525_s21 = sshll.u32 %s704_s16, 3  ;;  %v587_v4 = vld [vmem:[%s700_s1 + $0x20] sm:$0xff]   ;;  %v588_v7 = vld [vmem:[%s700_s1 + $0x18] sm:$0xff]   ;;  %v589_v8 = vld [vmem:[%s700_s1 + $0x10] sm:$0xff]   ;;  %s492_s13 = sshll.u32 %s704_s16, 2 }
   0xd   : > { %315 = vmatpush1.bf16.msra.mxu0 %v584_v0  ;;  %566 = vmatpush1.bf16.msra.mxu1 %v584_v0  ;;  %s657_s24 = scalar_lea.vmem %s699_s0, %s525_s21  ;;  %v590_v9 = vld [vmem:[%s700_s1 + $0x8] sm:$0xff]   ;;  %v591_v10 = vld [vmem:[%s700_s1] sm:$0xff]   ;;  %s175_s17 = scalar_lea.vmem %s702_s3, %s492_s13 }
   0xe   : > { %316 = vmatprep.subr.bf16.mxu0 %v613_v1  ;;  %558 = vmatprep.subr.bf16.mxu1 %v613_v1  ;;  %v595_v5 = vld [vmem:[%s657_s24 + $0x4] ss:$8 sps:$4 sm:$0xff]   ;;  %v593_v12 = vld [vmem:[%s657_s24] ss:$8 sps:$4 sm:$0xff]   ;;  %v599_v14 = vld [vmem:[%s657_s24 + $0x14] ss:$8 sps:$4 sm:$0xff]  }
   0xf   : > { %v598_v6 = vld [vmem:[%s657_s24 + $0x24] ss:$8 sps:$4 sm:$0xff]   ;;  %511 = vmatprep.mubr.msk.bf16.mxu0 %vm301_vm0, %v595_v5  ;;  %v596_v13 = vld [vmem:[%s657_s24 + $0x20] ss:$8 sps:$4 sm:$0xff]   ;;  %v601_v15 = vld [vmem:[%s657_s24 + $0x34] ss:$8 sps:$4 sm:$0xff]  }
  0x10   : > { %513 = vmatprep.mubr.msk.bf16.mxu1 %vm301_vm0, %v598_v6  ;;  %v592_v11 = vld [vmem:[%s700_s1 + $0x40] sm:$0xff]   ;;  %v603_v16 = vld [vmem:[%s657_s24 + $0x10] ss:$8 sps:$4 sm:$0xff]  }
  0x11   : > { %317 = vmatpush1.bf16.msra.mxu0 %v585_v2  ;;  %567 = vmatpush1.bf16.msra.mxu1 %v585_v2  ;;  %v604_v17 = vld [vmem:[%s657_s24 + $0x30] ss:$8 sps:$4 sm:$0xff]   ;;  %v493_v18 = vld [vmem:[%s701_s2] ss:$0 sm:$0xff] }
  0x12   : > { %318 = vmatprep.subr.bf16.mxu0 %v613_v1  ;;  %559 = vmatprep.subr.bf16.mxu1 %v613_v1 }
  0x15   : > { %319 = vmatpush1.bf16.msra.mxu0 %v586_v3  ;;  %568 = vmatpush1.bf16.msra.mxu1 %v586_v3 }
  0x16   : > { %320 = vmatprep.subr.bf16.mxu0 %v613_v1  ;;  %560 = vmatprep.subr.bf16.mxu1 %v613_v1 }
  0x19   : > { %321 = vmatpush1.bf16.msra.mxu0 %v587_v4  ;;  %569 = vmatpush1.bf16.msra.mxu1 %v587_v4 }
  0x1a   : > { %322 = vmatprep.subr.bf16.mxu0 %v613_v1  ;;  %561 = vmatprep.subr.bf16.mxu1 %v613_v1 }
  0x1d   : > { %323 = vmatpush1.bf16.msra.mxu0 %v588_v7  ;;  %570 = vmatpush1.bf16.msra.mxu1 %v588_v7 }
  0x1e   : > { %324 = vmatprep.subr.bf16.mxu0 %v613_v1  ;;  %562 = vmatprep.subr.bf16.mxu1 %v613_v1 }
  0x21   : > { %325 = vmatpush1.bf16.msra.mxu0 %v589_v8  ;;  %571 = vmatpush1.bf16.msra.mxu1 %v589_v8 }
  0x22   : > { %326 = vmatprep.subr.bf16.mxu0 %v613_v1  ;;  %563 = vmatprep.subr.bf16.mxu1 %v613_v1 }
  0x25   : > { %327 = vmatpush1.bf16.msra.mxu0 %v590_v9  ;;  %572 = vmatpush1.bf16.msra.mxu1 %v590_v9 }
  0x26   : > { %328 = vmatprep.subr.bf16.mxu0 %v613_v1  ;;  %564 = vmatprep.subr.bf16.mxu1 %v613_v1 }
  0x29   : > { %329 = vmatpush1.bf16.msra.mxu0 %v591_v10  ;;  %573 = vmatpush1.bf16.msra.mxu1 %v591_v10 }
  0x2a   : > { %344 = vmatprep.subr.bf16.mxu0 %v613_v1  ;;  %565 = vmatprep.subr.bf16.mxu1 %v613_v1 }
  0x2d   : > { %345 = vmatpush2.bf16.msra.mxu0 %v592_v11  ;;  %574 = vmatpush2.bf16.msra.mxu1 %v592_v11 }
  0x30   : > { %347 = vmatmul.mubr.bf16.vlgmr.msra.gmra.mxu0 %v593_v12  ;;  %363 = vmatmul.mubr.bf16.vlgmr.msra.gmra.mxu1 %v596_v13 }
  0x31   : > { %512 = vmatprep.mubr.msk.bf16.mxu0 %vm301_vm0, %v599_v14  ;;  %514 = vmatprep.mubr.msk.bf16.mxu1 %vm301_vm0, %v601_v15 }
  0x38   : > { %355 = vmatmul.mubr.bf16.gmra.mxu0 %v603_v16  ;;  %371 = vmatmul.mubr.bf16.gmra.mxu1 %v604_v17 }
  0xf0   : > { %v348_v19 = vpop.f32.mrf.mxu0  ;;  %v364_v20 = vpop.f32.mrf.mxu1 }
  0xf1   : > { %v349_v23 = vadd.f32 %v493_v18, %v348_v19  ;;  %v365_v24 = vadd.f32 %v493_v18, %v364_v20 }
  0xf2   : > { %v350_v21 = vpop.f32.mrf.mxu0  ;;  %v366_v22 = vpop.f32.mrf.mxu1 }
  0xf3   : > { %v379_v31 = vmax.f32 %v349_v23, 0.0  ;;  %v383_v32 = vmax.f32 %v365_v24, 0.0 }
  0xf4   : > { %v351_v25 = vpop.f32.mrf.mxu0  ;;  %v367_v26 = vpop.f32.mrf.mxu1 }
  0xf5   : > { %v352_v27 = vadd.f32 %v493_v18, %v351_v25  ;;  %v368_v28 = vadd.f32 %v493_v18, %v367_v26 }
  0xf6   : > { %v353_v29 = vpop.f32.mrf.mxu0  ;;  %v369_v30 = vpop.f32.mrf.mxu1 }
  0xf7   : > { %v380_v33 = vmax.f32 %v352_v27, 0.0  ;;  %v384_v34 = vmax.f32 %v368_v28, 0.0 }
  0xf8   : > { %v356_v35 = vpop.f32.mrf.mxu0  ;;  %v372_v36 = vpop.f32.mrf.mxu1 }
  0xf9   : > { %v537_v37 = vpack.c.bf16 %v380_v33, %v379_v31  ;;  %v547_v38 = vpack.c.bf16 %v384_v34, %v383_v32  ;;  %v357_v41 = vadd.f32 %v493_v18, %v356_v35  ;;  %v373_v42 = vadd.f32 %v493_v18, %v372_v36 }
  0xfa   : > { %v358_v39 = vpop.f32.mrf.mxu0  ;;  %v374_v40 = vpop.f32.mrf.mxu1 }
  0xfb   : > { %538 = vst [vmem:[%s175_s17] sm:$0xff] %v537_v37   ;;  %555 = vst [vmem:[%s175_s17 + $0x10] sm:$0xff] %v547_v38   ;;  %v381_v49 = vmax.f32 %v357_v41, 0.0  ;;  %v385_v50 = vmax.f32 %v373_v42, 0.0 }
  0xfc   : > { %v359_v43 = vpop.f32.mrf.mxu0  ;;  %v375_v44 = vpop.f32.mrf.mxu1 }
  0xfd   : > { %v360_v45 = vadd.f32 %v493_v18, %v359_v43  ;;  %v376_v46 = vadd.f32 %v493_v18, %v375_v44 }
  0xfe   : > { %v361_v47 = vpop.f32.mrf.mxu0  ;;  %v377_v48 = vpop.f32.mrf.mxu1 }
  0xff   : > { %v382_v51 = vmax.f32 %v360_v45, 0.0  ;;  %v386_v52 = vmax.f32 %v376_v46, 0.0 }
 0x101   : > { %v542_v53 = vpack.c.bf16 %v382_v51, %v381_v49  ;;  %v552_v54 = vpack.c.bf16 %v386_v52, %v385_v50 }
 0x103   : > { %554 = vst [vmem:[%s175_s17 + $0x8] sm:$0xff] %v542_v53   ;;  %556 = vst [vmem:[%s175_s17 + $0x18] sm:$0xff] %v552_v54  }
 0x104 PF: > { %s13_s12 = sadd.s32 1, %s611_s12  }
 0x105   : > { %p10_p4 = scmp.ge.s32.totalorder %s13_s12, 4  }
 0x107   :  { %12 = sbr.rel (!%p10_p4) target bundleno = 1 (0x1), region = 62 }

// kernel: faster_rcnn_forward.7
= control target key start
LH: loop header
LB: loop body
LE: loop exit
PB: predicated region body
PF: predicated region fallthrough
CT: control target
= control target key end

     0   :  { %s882_s12 = smov 0   ;;  %s978_s0 = inlined_call_operand.vmem [shape: bf16[128,288], index: 0, kind: input, shape index: {}]   ;;  %s979_s1 = inlined_call_operand.vmem [shape: bf16[288,128], index: 1, kind: input, shape index: {}]   ;;  %s980_s2 = inlined_call_operand.vmem [shape: f32[1,128], index: 2, kind: input, shape index: {}]   ;;  %s981_s3 = inlined_call_operand.vmem [shape: bf16[128,128], index: 3, kind: output, shape index: {}]  }
   0x1 LB: > { %s652_s13 = sadd.s32 4294967295, %s860_s12   ;;  %p656_p0 = scmp.ge.s32.totalorder %s860_s12, 1  ;;  %s860_s12 = sphi %s882_s12, %s13_s12  }
   0x2   : > { %p139_p1 = scmp.lt.s32.totalorder %s860_s12, 3 }
   0x4   : > { %p140_p2 = pnand %p656_p0, %p139_p1 }
   0x5   : > { %s657_s16 = sshll.u32 (!%p140_p2), %s652_s13, 3 }
   0x6   : > { %143 = sbr.rel (%p140_p2) target bundleno = 270 (0x10e), region = 32  ;;  %p165_p3 = scmp.lt.s32.totalorder (!%p140_p2), %s657_s16, 15 }
   0xb   : > { %v820_v0 = vld [vmem:[%s979_s1 + $0x78] sm:$0xff]   ;;  %v822_v2 = vld [vmem:[%s979_s1 + $0x70] sm:$0xff]   ;;  %v824_v4 = vld [vmem:[%s979_s1 + $0x68] sm:$0xff]   ;;  %s983_s16 = smov (!%p165_p3, %s657_s16), 15  ;;  %vm405_vm0 = vcmask 261120  }
   0xc   : > { %v821_v1 = vld [vmem:[%s979_s1 + $0x38] sm:$0xff]   ;;  %737 = vmatprep.subr.bf16.mxu0 %v820_v0  ;;  %795 = vmatprep.subr.bf16.mxu1 %v820_v0  ;;  %v823_v3 = vld [vmem:[%s979_s1 + $0x30] sm:$0xff]   ;;  %v825_v5 = vld [vmem:[%s979_s1 + $0x28] sm:$0xff]   ;;  %s811_s29 = smul.u32 12, %s983_s16  ;;  %s660_s5 = sshll.u32 %s983_s16, 2 }
   0xd   : > { %738 = vmatpush3.bf16.msra.mxu0 %v821_v1  ;;  %803 = vmatpush3.bf16.msra.mxu1 %v821_v1  ;;  %v826_v6 = vld [vmem:[%s979_s1 + $0x60] sm:$0xff]   ;;  %v828_v8 = vld [vmem:[%s979_s1 + $0x58] sm:$0xff]   ;;  %v830_v10 = vld [vmem:[%s979_s1 + $0x50] sm:$0xff]   ;;  %s175_s8 = scalar_lea.vmem %s981_s3, %s660_s5 }
   0xe   : > { %739 = vmatprep.subr.bf16.mxu0 %v822_v2  ;;  %796 = vmatprep.subr.bf16.mxu1 %v822_v2  ;;  %v827_v7 = vld [vmem:[%s979_s1 + $0x20] sm:$0xff]   ;;  %s923_s9 = scalar_lea.vmem %s978_s0, %s811_s29  ;;  %v829_v9 = vld [vmem:[%s979_s1 + $0x18] sm:$0xff]   ;;  %v831_v13 = vld [vmem:[%s979_s1 + $0x10] sm:$0xff]  }
   0xf   : > { %v838_v11 = vld [vmem:[%s923_s9 + $0x4] ss:$12 sps:$4 sm:$0xff]   ;;  %v841_v12 = vld [vmem:[%s923_s9 + $0x4c] ss:$12 sps:$4 sm:$0xff]   ;;  %v839_v20 = vld [vmem:[%s923_s9 + $0x48] ss:$12 sps:$4 sm:$0xff]  }
  0x10   : > { %v832_v14 = vld [vmem:[%s979_s1 + $0x48] sm:$0xff]   ;;  %450 = vmatprep.mubr.bf16.mxu0 %v838_v11  ;;  %474 = vmatprep.mubr.bf16.mxu1 %v841_v12  ;;  %v834_v16 = vld [vmem:[%s979_s1 + $0x40] sm:$0xff]   ;;  %v852_v28 = vld [vmem:[%s923_s9 + $0x30] ss:$12 sps:$4 sm:$0xff]  }
  0x11   : > { %740 = vmatpush3.bf16.msra.mxu0 %v823_v3  ;;  %804 = vmatpush3.bf16.msra.mxu1 %v823_v3  ;;  %v833_v15 = vld [vmem:[%s979_s1 + $0x8] sm:$0xff]   ;;  %v835_v17 = vld [vmem:[%s979_s1] sm:$0xff]   ;;  %v853_v29 = vld [vmem:[%s923_s9 + $0x50] ss:$12 sps:$4 sm:$0xff]  }
  0x12   : > { %741 = vmatprep.subr.bf16.mxu0 %v824_v4  ;;  %797 = vmatprep.subr.bf16.mxu1 %v824_v4  ;;  %v842_v18 = vld [vmem:[%s979_s1 + $0x88] sm:$0xff]   ;;  %v843_v22 = vld [vmem:[%s979_s1 + $0x80] sm:$0xff]  }
  0x13   : > { %v836_v19 = vld [vmem:[%s923_s9] ss:$12 sps:$4 sm:$0xff]   ;;  %v844_v21 = vld [vmem:[%s923_s9 + $0x1c] ss:$12 sps:$4 sm:$0xff]   ;;  %v847_v24 = vld [vmem:[%s923_s9 + $0x18] ss:$12 sps:$4 sm:$0xff]  }
  0x14   : > { %v846_v23 = vld [vmem:[%s923_s9 + $0x8] ss:$12 sps:$4 sm:$0xff]   ;;  %v848_v25 = vld [vmem:[%s923_s9 + $0x20] ss:$12 sps:$4 sm:$0xff]   ;;  %v851_v27 = vld [vmem:[%s923_s9 + $0x38] ss:$12 sps:$4 sm:$0xff]  }
  0x15   : > { %742 = vmatpush3.bf16.msra.mxu0 %v825_v5  ;;  %805 = vmatpush3.bf16.msra.mxu1 %v825_v5  ;;  %v849_v26 = vld [vmem:[%s923_s9 + $0x34] ss:$12 sps:$4 sm:$0xff]  }
  0x16   : > { %743 = vmatprep.subr.bf16.mxu0 %v826_v6  ;;  %798 = vmatprep.subr.bf16.mxu1 %v826_v6  ;;  %v661_v41 = vld [vmem:[%s980_s2] ss:$0 sm:$0xff] }
  0x19   : > { %744 = vmatpush3.bf16.msra.mxu0 %v827_v7  ;;  %806 = vmatpush3.bf16.msra.mxu1 %v827_v7 }
  0x1a   : > { %745 = vmatprep.subr.bf16.mxu0 %v828_v8  ;;  %799 = vmatprep.subr.bf16.mxu1 %v828_v8 }
  0x1d   : > { %746 = vmatpush3.bf16.msra.mxu0 %v829_v9  ;;  %807 = vmatpush3.bf16.msra.mxu1 %v829_v9 }
  0x1e   : > { %747 = vmatprep.subr.bf16.mxu0 %v830_v10  ;;  %800 = vmatprep.subr.bf16.mxu1 %v830_v10 }
  0x21   : > { %748 = vmatpush3.bf16.msra.mxu0 %v831_v13  ;;  %808 = vmatpush3.bf16.msra.mxu1 %v831_v13 }
  0x22   : > { %749 = vmatprep.subr.bf16.mxu0 %v832_v14  ;;  %801 = vmatprep.subr.bf16.mxu1 %v832_v14 }
  0x25   : > { %750 = vmatpush3.bf16.msra.mxu0 %v833_v15  ;;  %809 = vmatpush3.bf16.msra.mxu1 %v833_v15 }
  0x26   : > { %751 = vmatprep.subr.bf16.mxu0 %v834_v16  ;;  %802 = vmatprep.subr.bf16.mxu1 %v834_v16 }
  0x29   : > { %752 = vmatpush3.bf16.msra.mxu0 %v835_v17  ;;  %810 = vmatpush3.bf16.msra.mxu1 %v835_v17 }
  0x2a   : > { %783 = vmatprep.subr.bf16.mxu1 %v842_v18 }
  0x2c   : > { %451 = vmatmul.mubr.bf16.vlgmr.msra.gmra.mxu0 %v836_v19  ;;  %475 = vmatmul.mubr.bf16.vlgmr.msra.gmra.mxu1 %v839_v20 }
  0x2d   : > { %784 = vmatpush3.bf16.msra.mxu1 %v842_v18  ;;  %458 = vmatprep.mubr.bf16.mxu0 %v844_v21 }
  0x2e   : > { %785 = vmatprep.subr.bf16.mxu1 %v843_v22  ;;  %787 = vmatprep.mubr.msk.bf16.mxu1 %vm405_vm0, %v846_v23 }
  0x31   : > { %786 = vmatpush3.bf16.msra.mxu1 %v843_v22 }
  0x34   : > { %459 = vmatmul.mubr.bf16.gmra.mxu0 %v847_v24  ;;  %788 = vmatmul.mubr.msk.bf16.vlgmr.msra.gmra.mxu1 %vm405_vm0, %v848_v25 }
  0x35   : > { %466 = vmatprep.mubr.bf16.mxu0 %v849_v26  ;;  %791 = vmatprep.mubr.msk.bf16.mxu1 %vm405_vm0, %v851_v27 }
  0x3c   : > { %467 = vmatmul.mubr.bf16.gmra.mxu0 %v852_v28  ;;  %792 = vmatmul.mubr.msk.bf16.gmra.mxu1 %vm405_vm0, %v853_v29 }
  0xec   : > { %v753_v30 = vpop.f32.mrf.mxu0  ;;  %v771_v31 = vpop.f32.mrf.mxu1 }
  0xee   : > { %v754_v32 = vpop.f32.mrf.mxu0  ;;  %v772_v33 = vpop.f32.mrf.mxu1 }
  0xef   : > { %v755_v38 = vadd.f32 %v754_v32, %v753_v30  ;;  %v773_v47 = vadd.f32 %v772_v33, %v771_v31 }
  0xf0   : > { %v756_v34 = vpop.f32.mrf.mxu0  ;;  %v774_v35 = vpop.f32.mrf.mxu1 }
  0xf1   : > { %v453_v46 = vadd.f32 %v755_v38, %v661_v41  ;;  %v477_v59 = vadd.f32 %v773_v47, %v661_v41 }
  0xf2   : > { %v757_v36 = vpop.f32.mrf.mxu0  ;;  %v775_v37 = vpop.f32.mrf.mxu1 }
  0xf3   : > { %v758_v42 = vadd.f32 %v757_v36, %v756_v34  ;;  %v776_v53 = vadd.f32 %v775_v37, %v774_v35 }
  0xf4   : > { %v759_v39 = vpop.f32.mrf.mxu0  ;;  %v789_v40 = vpop.f32.mrf.mxu1 }
  0xf5   : > { %v456_v52 = vadd.f32 %v758_v42, %v661_v41  ;;  %v480_v3 = vadd.f32 %v776_v53, %v661_v41 }
  0xf6   : > { %v760_v43 = vpop.f32.mrf.mxu0  ;;  %v517_v44 = vpop.f32.mrf.mxu1 }
  0xf7   : > { %v761_v45 = vadd.f32 %v760_v43, %v759_v39  ;;  %v518_v51 = vadd.f32 %v517_v44, %v453_v46 }
  0xf8   : > { %v762_v48 = vpop.f32.mrf.mxu0  ;;  %v790_v49 = vpop.f32.mrf.mxu1 }
  0xf9   : > { %v461_v50 = vadd.f32 %v761_v45, %v661_v41  ;;  %v548_v62 = vmax.f32 %v518_v51, 0.0 }
  0xfa   : > { %v763_v54 = vpop.f32.mrf.mxu0  ;;  %v520_v55 = vpop.f32.mrf.mxu1 }
  0xfb   : > { %v764_v56 = vadd.f32 %v763_v54, %v762_v48  ;;  %v521_v57 = vadd.f32 %v520_v55, %v456_v52  ;;  %v526_v61 = vadd.f32 %v789_v40, %v461_v50 }
  0xfc   : > { %v765_v58 = vpop.f32.mrf.mxu0  ;;  %v793_v60 = vpop.f32.mrf.mxu1 }
  0xfd   : > { %v464_v63 = vadd.f32 %v764_v56, %v661_v41  ;;  %v549_v0 = vmax.f32 %v521_v57, 0.0  ;;  %v542_v6 = vadd.f32 %v793_v60, %v477_v59  ;;  %v550_v10 = vmax.f32 %v526_v61, 0.0 }
  0xfe   : > { %v766_v1 = vpop.f32.mrf.mxu0  ;;  %v533_v2 = vpop.f32.mrf.mxu1 }
  0xff   : > { %v529_v4 = vadd.f32 %v790_v49, %v464_v63  ;;  %v717_v5 = vpack.c.bf16 %v549_v0, %v548_v62  ;;  %v767_v7 = vadd.f32 %v766_v1, %v765_v58  ;;  %v554_v16 = vmax.f32 %v542_v6, 0.0 }
 0x100   : > { %v768_v8 = vpop.f32.mrf.mxu0  ;;  %v794_v9 = vpop.f32.mrf.mxu1 }
 0x101   : > { %v551_v11 = vmax.f32 %v529_v4, 0.0  ;;  %718 = vst [vmem:[%s175_s8] sm:$0xff] %v717_v5   ;;  %v469_v12 = vadd.f32 %v767_v7, %v661_v41  ;;  %v545_v13 = vadd.f32 %v794_v9, %v480_v3 }
 0x102   : > { %v769_v14 = vpop.f32.mrf.mxu0  ;;  %v536_v22 = vpop.f32.mrf.mxu1 }
 0x103   : > { %v722_v15 = vpack.c.bf16 %v551_v11, %v550_v10  ;;  %v555_v17 = vmax.f32 %v545_v13, 0.0  ;;  %v770_v18 = vadd.f32 %v769_v14, %v768_v8  ;;  %v534_v19 = vadd.f32 %v533_v2, %v469_v12 }
 0x105   : > { %734 = vst [vmem:[%s175_s8 + $0x8] sm:$0xff] %v722_v15   ;;  %v732_v20 = vpack.c.bf16 %v555_v17, %v554_v16  ;;  %v472_v21 = vadd.f32 %v770_v18, %v661_v41  ;;  %v552_v24 = vmax.f32 %v534_v19, 0.0 }
 0x107   : > { %736 = vst [vmem:[%s175_s8 + $0x18] sm:$0xff] %v732_v20   ;;  %v537_v23 = vadd.f32 %v536_v22, %v472_v21 }
 0x109   : > { %v553_v25 = vmax.f32 %v537_v23, 0.0 }
 0x10b   : > { %v727_v26 = vpack.c.bf16 %v553_v25, %v552_v24 }
 0x10d   : > { %735 = vst [vmem:[%s175_s8 + $0x10] sm:$0xff] %v727_v26  }
 0x10e PF: > { %s13_s12 = sadd.s32 1, %s860_s12  }
 0x10f   : > { %p10_p4 = scmp.ge.s32.totalorder %s13_s12, 4  }
 0x111   :  { %12 = sbr.rel (!%p10_p4) target bundleno = 1 (0x1), region = 62 }

// kernel: faster_rcnn_forward.8
= control target key start
LH: loop header
LB: loop body
LE: loop exit
PB: predicated region body
PF: predicated region fallthrough
CT: control target
= control target key end

     0   :  { %s454_s12 = smov 0   ;;  %s480_s0 = inlined_call_operand.vmem [shape: bf16[128,32], index: 0, kind: input, shape index: {}]   ;;  %s481_s1 = inlined_call_operand.vmem [shape: bf16[32,128], index: 1, kind: input, shape index: {}]   ;;  %s482_s2 = inlined_call_operand.vmem [shape: f32[1,128], index: 2, kind: input, shape index: {}]   ;;  %s483_s3 = inlined_call_operand.vmem [shape: f32[128,128], index: 3, kind: output, shape index: {}]  }
   0x1 LB: > { %s368_s13 = sadd.s32 4294967295, %s432_s12   ;;  %p372_p0 = scmp.ge.s32.totalorder %s432_s12, 1  ;;  %s432_s12 = sphi %s454_s12, %s13_s12  }
   0x2   : > { %p138_p1 = scmp.lt.s32.totalorder %s432_s12, 3 }
   0x4   : > { %p139_p2 = pnand %p372_p0, %p138_p1 }
   0x5   : > { %s373_s16 = sshll.u32 (!%p139_p2), %s368_s13, 3 }
   0x6   : > { %142 = sbr.rel (%p139_p2) target bundleno = 222 (0xde), region = 32  ;;  %p163_p3 = scmp.lt.s32.totalorder (!%p139_p2), %s373_s16, 15 }
   0xb   : > { %v420_v0 = vld [vmem:[%s481_s1 + $0x8] sm:$0xff]   ;;  %v421_v1 = vld [vmem:[%s481_s1] sm:$0xff]   ;;  %s485_s16 = smov (!%p163_p3, %s373_s16), 15  ;;  %vm226_vm0 = vcmask 261120  }
   0xc   : > { %396 = vmatprep.subr.bf16.mxu0 %v420_v0  ;;  %408 = vmatprep.subr.bf16.mxu1 %v420_v0  ;;  %s374_s19 = sshll.u32 %s485_s16, 2  ;;  %s376_s23 = sshll.u32 %s485_s16, 3  ;;  %v377_v6 = vld [vmem:[%s482_s2] ss:$0 sm:$0xff] }
   0xd   : > { %397 = vmatpush3.bf16.msra.mxu0 %v420_v0  ;;  %410 = vmatpush3.bf16.msra.mxu1 %v420_v0  ;;  %s166_s22 = scalar_lea.vmem %s480_s0, %s374_s19  ;;  %s172_s28 = scalar_lea.vmem %s483_s3, %s376_s23 }
   0xe   : > { %398 = vmatprep.subr.bf16.mxu0 %v421_v1  ;;  %409 = vmatprep.subr.bf16.mxu1 %v421_v1  ;;  %v422_v2 = vld [vmem:[%s166_s22] sm:$0xff]   ;;  %v423_v3 = vld [vmem:[%s166_s22 + $0x10] sm:$0xff]   ;;  %v424_v4 = vld [vmem:[%s166_s22 + $0x8] sm:$0xff]  }
   0xf   : > { %400 = vmatprep.mubr.msk.bf16.mxu0 %vm226_vm0, %v422_v2  ;;  %404 = vmatprep.mubr.msk.bf16.mxu1 %vm226_vm0, %v423_v3  ;;  %v425_v5 = vld [vmem:[%s166_s22 + $0x18] sm:$0xff]  }
  0x11   : > { %399 = vmatpush3.bf16.msra.mxu0 %v421_v1  ;;  %411 = vmatpush3.bf16.msra.mxu1 %v421_v1 }
  0x14   : > { %401 = vmatmul.mubr.msk.bf16.vlgmr.msra.gmra.mxu0 %vm226_vm0, %v424_v4  ;;  %405 = vmatmul.mubr.msk.bf16.vlgmr.msra.gmra.mxu1 %vm226_vm0, %v425_v5 }
  0xd4   : > { %v402_v7 = vpop.f32.mrf.mxu0  ;;  %v406_v9 = vpop.f32.mrf.mxu1 }
  0xd5   : > { %v282_v8 = vadd.f32 %v402_v7, %v377_v6  ;;  %v298_v10 = vadd.f32 %v406_v9, %v377_v6 }
  0xd6   : > { %v273_v11 = vpop.f32.mrf.mxu0  ;;  %v289_v13 = vpop.f32.mrf.mxu1 }
  0xd7   : > { %306 = vst [vmem:[%s172_s28 + $0x10] sm:$0xff] %v282_v8  ;;  %v274_v12 = vadd.f32 %v377_v6, %v273_v11  ;;  %310 = vst [vmem:[%s172_s28 + $0x30] sm:$0xff] %v298_v10  ;;  %v290_v14 = vadd.f32 %v377_v6, %v289_v13 }
  0xd8   : > { %v403_v15 = vpop.f32.mrf.mxu0  ;;  %v407_v17 = vpop.f32.mrf.mxu1 }
  0xd9   : > { %304 = vst [vmem:[%s172_s28] sm:$0xff] %v274_v12  ;;  %v285_v16 = vadd.f32 %v403_v15, %v377_v6  ;;  %308 = vst [vmem:[%s172_s28 + $0x20] sm:$0xff] %v290_v14  ;;  %v301_v18 = vadd.f32 %v407_v17, %v377_v6 }
  0xda   : > { %v276_v19 = vpop.f32.mrf.mxu0  ;;  %v292_v21 = vpop.f32.mrf.mxu1 }
  0xdb   : > { %307 = vst [vmem:[%s172_s28 + $0x18] sm:$0xff] %v285_v16  ;;  %v277_v20 = vadd.f32 %v377_v6, %v276_v19  ;;  %311 = vst [vmem:[%s172_s28 + $0x38] sm:$0xff] %v301_v18  ;;  %v293_v22 = vadd.f32 %v377_v6, %v292_v21 }
  0xdd   : > { %305 = vst [vmem:[%s172_s28 + $0x8] sm:$0xff] %v277_v20  ;;  %309 = vst [vmem:[%s172_s28 + $0x28] sm:$0xff] %v293_v22 }
  0xde PF: > { %s13_s12 = sadd.s32 1, %s432_s12  }
  0xdf   : > { %p10_p4 = scmp.ge.s32.totalorder %s13_s12, 4  }
  0xe1   :  { %12 = sbr.rel (!%p10_p4) target bundleno = 1 (0x1), region = 62 }

// kernel: faster_rcnn_forward.9
= control target key start
LH: loop header
LB: loop body
LE: loop exit
PB: predicated region body
PF: predicated region fallthrough
CT: control target
= control target key end

     0   :  { %s549_s18 = smov 0   ;;  %s596_s0 = inlined_call_operand.vmem [shape: bf16[16,32], index: 0, kind: input, shape index: {}]   ;;  %s597_s1 = inlined_call_operand.vmem [shape: bf16[32,64], index: 1, kind: input, shape index: {}]   ;;  %s598_s2 = inlined_call_operand.vmem [shape: f32[1,64], index: 2, kind: input, shape index: {}]   ;;  %s599_s3 = inlined_call_operand.vmem [shape: bf16[64,128], index: 3, kind: input, shape index: {}]   ;;  %s600_s4 = inlined_call_operand.vmem [shape: f32[1,128], index: 4, kind: input, shape index: {}]   ;;  %s601_s5 = inlined_call_operand.vmem [shape: f32[16,128], index: 5, kind: output, shape index: {}]  }
   0x1 LB: > { %s442_s19 = sadd.s32 4294967295, %s515_s18   ;;  %p446_p0 = scmp.ge.s32.totalorder %s515_s18, 1  ;;  %s515_s18 = sphi %s549_s18, %s15_s18  }
   0x2   : > { %p186_p1 = scmp.lt.s32.totalorder %s515_s18, 3 }
   0x4   : > { %p187_p2 = pnand %p446_p0, %p186_p1 }
   0x5   : > { %p212_p3 = scmp.lt.s32.totalorder (!%p187_p2), %s442_s19, 1 }
   0x6   : > { %190 = sbr.rel (%p187_p2) target bundleno = 727 (0x2d7), region = 40 }
   0xb   : > { %v499_v0 = vld [vmem:[%s597_s1 + $0x8] sm:$0xff]   ;;  %v517_v1 = vmov 0.0   ;;  %v500_v2 = vld [vmem:[%s597_s1] sm:$0xff]   ;;  %vm518_vm0 = vmmov 0   ;;  %v501_v3 = vld [vmem:[%s599_s3 + $0x18] sm:$0xff]   ;;  %s603_s19 = smov (!%p212_p3, %s442_s19), 1  ;;  %v374_v16 = vlaneseq }
   0xc   : > { %469 = vmatprep.subr.bf16.mxu0 %v517_v1  ;;  %477 = vmatprep.subr.bf16.mxu1 %v517_v1  ;;  %v502_v4 = vld [vmem:[%s599_s3 + $0x10] sm:$0xff]   ;;  %s447_s28 = sshll.u32 %s603_s19, 2  ;;  %vm245_vm1 = vcmask 261120   ;;  %v503_v6 = vld [vmem:[%s599_s3 + $0x8] sm:$0xff]   ;;  %v504_v7 = vld [vmem:[%s599_s3] sm:$0xff]   ;;  %vm330_vm2 = vcmask 523264  }
   0xd   : > { %470 = vmatpush3.bf16.msra.mxu0 %v499_v0  ;;  %473 = vmatprep.mubr.msk.bf16.mxu0 %vm518_vm0, %v517_v1  ;;  %s215_s6 = scalar_lea.vmem %s596_s0, %s447_s28  ;;  %v449_v8 = vld [vmem:[%s598_s2] ss:$0 sm:$0xff]  ;;  %v375_v17 = vand.u32 127, %v374_v16  ;;  %s448_s15 = sshll.u32 %s603_s19, 3 }
   0xe   : > { %471 = vmatprep.subr.bf16.mxu0 %v517_v1  ;;  %485 = vmatprep.mubr.msk.bf16.mxu1 %vm518_vm0, %v517_v1  ;;  %v221_v5 = vld [vmem:[%s215_s6] sm:$0xf]  ;;  %s219_s20 = scalar_lea.vmem %s601_s5, %s448_s15 }
   0xf   : > { %478 = vmatpush3.bf16.msra.mxu1 %v501_v3  ;;  %v453_v18 = vld [vmem:[%s600_s4] ss:$0 sm:$0xff]  ;;  %vm376_vm3 = vcmp.lt.s32.totalorder %v375_v17, 5 }
  0x10   : > { %479 = vmatprep.subr.bf16.mxu1 %v517_v1 }
  0x11   : > { %472 = vmatpush3.bf16.msra.mxu0 %v500_v2 }
  0x13   : > { %480 = vmatpush3.bf16.msra.mxu1 %v502_v4 }
  0x14   : > { %474 = vmatmul.mubr.msk.bf16.vlgmr.msra.gmra.mxu0 %vm245_vm1, %v221_v5  ;;  %481 = vmatprep.subr.bf16.mxu1 %v517_v1 }
  0x17   : > { %482 = vmatpush3.bf16.msra.mxu1 %v503_v6 }
  0x18   : > { %483 = vmatprep.subr.bf16.mxu1 %v517_v1 }
  0x1b   : > { %484 = vmatpush3.bf16.msra.mxu1 %v504_v7 }
  0xd4   : > { %v283_v9 = vpop.f32.mrf.mxu0 }
  0xd5   : > { %v284_v10 = vadd.f32 %v449_v8, %v283_v9 }
  0xd6   : > { %v475_v11 = vpop.f32.mrf.mxu0 }
  0xd7   : > { %v289_v12 = vmax.f32 %v284_v10, 0.0 }
  0xd8   : > { %v286_v13 = vpop.f32.mrf.mxu0 }
  0xd9   : > { %v290_v14 = vpack.c.bf16 %v289_v12, %v289_v12 }
  0xda   : > { %v476_v15 = vpop.f32.mrf.mxu0 }
  0xdb   : > { %486 = vmatmul.mubr.msk.bf16.vlgmr.msra.gmra.mxu1 %vm330_vm2, %v290_v14 }
 0x19b   : > { %v368_v19 = vpop.f32.mrf.mxu1 }
 0x19c   : > { %v369_v20 = vadd.f32 %v453_v18, %v368_v19 }
 0x19d   : > { %v487_v21 = vpop.f32.mrf.mxu1 }
 0x19e   : > { %v377_v22 = vsel %vm376_vm3, %v369_v20, -1e+30 }
 0x19f   : > { %378 = vmax.xlane.f32.xlu0 %v377_v22  ;;  %v371_v23 = vpop.f32.mrf.mxu1 }
 0x1a1   : > { %v488_v24 = vpop.f32.mrf.mxu1 }
 0x228   : > { %v379_v25 = vpop.xlane.xlu0 %378 }
 0x229   : > { %v380_v26 = vsub.f32 %v377_v22, %v379_v25 }
 0x22b   : > { %v381_v27 = vmul.f32 1.442695, %v380_v26 }
 0x22d   : > { %505 = vpow2.f32 %v381_v27 }
 0x23a   : > { %v506_v28 = vpop.eup %505 }
 0x23b   : > { %383 = vadd.xlane.f32.xlu0 %v506_v28 }
 0x2c4   : > { %v384_v29 = vpop.xlane.xlu0 %383 }
 0x2c5   : > { %507 = vrcp.f32 %v384_v29 }
 0x2d2   : > { %v508_v30 = vpop.eup %507 }
 0x2d3   : > { %v386_v31 = vmul.f32 %v508_v30, %v506_v28 }
 0x2d5   : > { %v387_v32 = vsel %vm376_vm3, %v386_v31, %v369_v20 }
 0x2d6   : > { %388 = vst [vmem:[%s219_s20] sm:$0xff] %v387_v32 }
 0x2d7 PF: > { %s15_s18 = sadd.s32 1, %s515_s18  }
 0x2d8   : > { %p12_p4 = scmp.ge.s32.totalorder %s15_s18, 4  }
 0x2da   :  { %14 = sbr.rel (!%p12_p4) target bundleno = 1 (0x1), region = 70 }

</bundles_post_ra>
